<compile_context>
chip_gen: v7x
topology: tpu7x:2x2x1
jax: 0.10.0
libtpu: 0.0.40
codegen_flags: <defaults>
</compile_context>

<pallas_src>
import math

import jax
import jax.numpy as jnp
from jax.experimental import pallas as pl
from jax.experimental.pallas import tpu as pltpu


def _sgc_kernel(a_ref, s_ref, w1_ref, w2_ref, o_ref):
    """One block of Gb graphs per grid point.  a_ref holds the pre-normalized Ã."""
    gb, n_p, din_p = s_ref.shape
    hid_p = w1_ref.shape[1]
    dout_p = w2_ref.shape[1]
    cdt = a_ref.dtype                      # compute dtype of the propagations

    a = a_ref[...]                         # [Gb, Np, Np]  normalized adjacency

    # --- layer 1: relu( Ã (S W1) ) ------------------------------------------
    # Weight matmul over all Gb graphs at once (fills the MXU M dimension).
    x = jnp.dot(s_ref[...].reshape(gb * n_p, din_p), w1_ref[...],
                preferred_element_type=jnp.float32).reshape(gb, n_p, hid_p)
    h1 = jnp.einsum("gij,gjk->gik", a, x.astype(cdt),
                    preferred_element_type=jnp.float32)
    h1 = jnp.maximum(h1, 0.0)

    # --- layer 2: relu( Ã (h1 W2) ) ------------------------------------------
    y = jnp.dot(h1.reshape(gb * n_p, hid_p), w2_ref[...],
                preferred_element_type=jnp.float32).reshape(gb, n_p, dout_p)
    out = jnp.einsum("gij,gjk->gik", a, y.astype(cdt),
                     preferred_element_type=jnp.float32)
    o_ref[...] = jnp.maximum(out, 0.0).astype(o_ref.dtype)


def _round_up(x, m):
    return (x + m - 1) // m * m


def _choose_graph_block(b, n_p):
    # Enough graphs per step to fill >= ~512 rows of the weight matmuls and
    # amortize the ~0.35 us per-step overhead, while keeping the (double
    # buffered) A block comfortably small.
    rows_target = max(1, 512 // n_p)
    a_block_cap = max(1, (8 * 1024 * 1024) // (n_p * n_p * 4))
    return max(1, min(b, rows_target, a_block_cap))


def _vmem_limit_bytes():
    # v5e/v6e: 128 MiB physical -> ~100 MiB cap; v7x: 64 MiB -> ~48 MiB cap.
    try:
        cap = int(pltpu.get_tpu_info().vmem_capacity_bytes)
    except Exception:
        cap = 64 * 1024 * 1024
    return int(min(max(cap - 16 * 1024 * 1024, 32 * 1024 * 1024),
                   100 * 1024 * 1024))


def semantic_graph_conv(node_features, adjacency_matrix, w1, w2, *,
                        compute_dtype=jnp.float32):
    """Forward pass of SemanticGraphConvolutionalLayer.

    node_features : [N, input_dim]  or  [B, N, input_dim]
    adjacency     : [N, N]          or  [B, N, N]
    w1 : [input_dim, hidden_dim],  w2 : [hidden_dim, output_dim]
    compute_dtype : dtype of the two Ã-propagation matmuls (f32 exact;
                    bf16 for MXU peak on v6e/v7x, accumulation stays f32).
    """
    squeeze = node_features.ndim == 2
    if squeeze:
        node_features = node_features[None]
        adjacency_matrix = adjacency_matrix[None]

    b, n, din = node_features.shape
    hid = w1.shape[1]
    dout = w2.shape[1]

    # --- pad to TPU-friendly shapes (zero pads => exact result) --------------
    n_p = _round_up(n, 128)        # lane-dense A / dense contraction dims
    din_p = _round_up(din, 128)
    hid_p = _round_up(hid, 128)
    dout_p = _round_up(dout, 128)  # lane-dense output => unmasked stores

    gb = _choose_graph_block(b, n_p)
    b_p = _round_up(b, gb)

    # --- pad + normalize adjacency in one XLA fusion (Ã built outside) -------
    a_pad = jnp.pad(adjacency_matrix,
                    ((0, b_p - b), (0, n_p - n), (0, n_p - n)))
    degree = jnp.maximum(jnp.sum(a_pad, axis=-1, keepdims=True), 1.0)
    d_inv_sqrt = degree ** -0.5                                  # [Bp, Np, 1]
    a_norm = (d_inv_sqrt * a_pad * jnp.swapaxes(d_inv_sqrt, -1, -2)
              ).astype(compute_dtype)                            # [Bp, Np, Np]

    s_p = jnp.pad(node_features, ((0, b_p - b), (0, n_p - n), (0, din_p - din)))
    w1_p = jnp.pad(w1, ((0, din_p - din), (0, hid_p - hid)))
    w2_p = jnp.pad(w2, ((0, hid_p - hid), (0, dout_p - dout)))

    a_itemsize = jnp.dtype(compute_dtype).itemsize
    flops = 2 * b_p * (n_p * n_p * (hid_p + dout_p)
                       + n_p * (din_p * hid_p + hid_p * dout_p))
    bytes_accessed = (b_p * n_p * n_p * a_itemsize
                      + 4 * b_p * n_p * (din_p + dout_p)
                      + 4 * (din_p * hid_p + hid_p * dout_p))

    out = pl.pallas_call(
        _sgc_kernel,
        out_shape=jax.ShapeDtypeStruct((b_p, n_p, dout_p), jnp.float32),
        grid=(b_p // gb,),
        in_specs=[
            pl.BlockSpec((gb, n_p, n_p), lambda i: (i, 0, 0)),      # Ã block
            pl.BlockSpec((gb, n_p, din_p), lambda i: (i, 0, 0)),    # S block
            pl.BlockSpec((din_p, hid_p), lambda i: (0, 0)),         # W1 (resident)
            pl.BlockSpec((hid_p, dout_p), lambda i: (0, 0)),        # W2 (resident)
        ],
        out_specs=pl.BlockSpec((gb, n_p, dout_p), lambda i: (i, 0, 0)),
        compiler_params=pltpu.CompilerParams(
            dimension_semantics=("parallel",),       # shard graph blocks across TCs
            vmem_limit_bytes=_vmem_limit_bytes(),
        ),
        cost_estimate=pl.CostEstimate(flops=flops, transcendentals=0,
                                      bytes_accessed=bytes_accessed),
    )(a_norm, s_p, w1_p, w2_p)

    out = out[:b, :n, :dout]
    return out[0] if squeeze else out


def init_params(key, input_dim, hidden_dim, output_dim):
    """Deterministic init matching the module's reset_parameters()."""
    k1, k2 = jax.random.split(key)
    stdv1 = 1.0 / math.sqrt(hidden_dim)
    stdv2 = 1.0 / math.sqrt(output_dim)
    w1 = jax.random.uniform(k1, (input_dim, hidden_dim), jnp.float32,
                            minval=-stdv1, maxval=stdv1)
    w2 = jax.random.uniform(k2, (hidden_dim, output_dim), jnp.float32,
                            minval=-stdv2, maxval=stdv2)
    return w1, w2


def _reference(node_features, adjacency_matrix, w1, w2):
    """Pure-JAX reference mirroring the PyTorch forward (works batched too)."""
    degree = jnp.sum(adjacency_matrix, axis=-1, keepdims=True)
    degree = jnp.maximum(degree, 1.0)
    dinv = degree ** -0.5
    adj = dinv * adjacency_matrix * jnp.swapaxes(dinv, -2, -1)
    h1 = jax.nn.relu(adj @ (node_features @ w1))
    return jax.nn.relu(adj @ (h1 @ w2))


if __name__ == "__main__":
    B, N, input_dim, hidden_dim, output_dim = 4, 16, 32, 32, 16

    key = jax.random.PRNGKey(0)
    k_s, k_a, k_p = jax.random.split(key, 3)

    node_features = jax.random.normal(k_s, (B, N, input_dim), jnp.float32)
    # random symmetric binary adjacency with self loops, per graph
    a_raw = jax.random.uniform(k_a, (B, N, N), jnp.float32)
    adjacency = ((a_raw + jnp.swapaxes(a_raw, -1, -2)) > 1.0).astype(jnp.float32)
    adjacency = jnp.maximum(adjacency, jnp.eye(N, dtype=jnp.float32))

    w1, w2 = init_params(k_p, input_dim, hidden_dim, output_dim)

    # batched path, f32 propagations (exact vs. reference)
    out_b = jax.block_until_ready(
        semantic_graph_conv(node_features, adjacency, w1, w2))
    ref_b = _reference(node_features, adjacency, w1, w2)
    assert out_b.shape == (B, N, output_dim)
    assert jnp.allclose(out_b, ref_b, atol=1e-5, rtol=1e-5), "batched mismatch"

    # single-graph path (the original module's signature)
    out_1 = jax.block_until_ready(
        semantic_graph_conv(node_features[0], adjacency[0], w1, w2))
    ref_1 = _reference(node_features[0], adjacency[0], w1, w2)
    assert out_1.shape == (N, output_dim)
    assert jnp.allclose(out_1, ref_1, atol=1e-5, rtol=1e-5), "single mismatch"

    # bf16 propagation path (MXU-peak option for v6e/v7x) — looser tolerance
    out_bf = jax.block_until_ready(
        semantic_graph_conv(node_features, adjacency, w1, w2,
                            compute_dtype=jnp.bfloat16))
    assert out_bf.shape == (B, N, output_dim)
    assert jnp.allclose(out_bf, ref_b, atol=5e-2, rtol=5e-2), "bf16 mismatch"

    print("KERNEL_OK")
</pallas_src>

<mosaic_0001>
module attributes {stable_mosaic.version = 11 : i64} {
  func.func @_sgc_kernel(%arg0: i32, %arg1: memref<4x128x128xf32, #tpu.memory_space<vmem>>, %arg2: memref<4x128x128xf32, #tpu.memory_space<vmem>>, %arg3: memref<128x128xf32, #tpu.memory_space<vmem>>, %arg4: memref<128x128xf32, #tpu.memory_space<vmem>>, %arg5: memref<4x128x128xf32, #tpu.memory_space<vmem>>) attributes {dimension_semantics = [#tpu.dimension_semantics<parallel>], iteration_bounds = array<i64: 1>, scalar_prefetch = 0 : i64, scratch_operands = 0 : i64, tpu.core_type = #tpu.core_type<tc>, window_params = [{transform_indices = @transform_0, window_bounds = array<i64: 4, 128, 128>}, {transform_indices = @transform_1, window_bounds = array<i64: 4, 128, 128>}, {pipeline_mode = #tpu.pipeline_mode<synchronous>, transform_indices = @transform_2, window_bounds = array<i64: 128, 128>}, {pipeline_mode = #tpu.pipeline_mode<synchronous>, transform_indices = @transform_3, window_bounds = array<i64: 128, 128>}, {transform_indices = @transform_4, window_bounds = array<i64: 4, 128, 128>}]} {
    %c0 = arith.constant 0 : index
    %c0_0 = arith.constant 0 : index
    %c0_1 = arith.constant 0 : index
    %0 = vector.load %arg1[%c0, %c0_0, %c0_1] : memref<4x128x128xf32, #tpu.memory_space<vmem>>, vector<4x128x128xf32>
    %c0_2 = arith.constant 0 : index
    %c0_3 = arith.constant 0 : index
    %c0_4 = arith.constant 0 : index
    %1 = vector.load %arg2[%c0_2, %c0_3, %c0_4] : memref<4x128x128xf32, #tpu.memory_space<vmem>>, vector<4x128x128xf32>
    %2 = vector.shape_cast %1 : vector<4x128x128xf32> to vector<512x128xf32>
    %c0_5 = arith.constant 0 : index
    %c0_6 = arith.constant 0 : index
    %3 = vector.load %arg3[%c0_5, %c0_6] : memref<128x128xf32, #tpu.memory_space<vmem>>, vector<128x128xf32>
    %cst = arith.constant dense<0.000000e+00> : vector<512x128xf32>
    %4 = tpu.matmul %2, %3, %cst {dimension_numbers = #tpu.dot_dimension_numbers<[1], [0], [0], [1], [0, 0, 1, 1], [], []>} : vector<512x128xf32>, vector<128x128xf32>, vector<512x128xf32> -> vector<512x128xf32>
    %5 = vector.shape_cast %4 : vector<512x128xf32> to vector<4x128x128xf32>
    "tpu.trace_start"() <{level = 10 : i32, message = "gij,gjk->gik"}> : () -> ()
    %cst_7 = arith.constant dense<0.000000e+00> : vector<4x128x128xf32>
    %6 = tpu.matmul %0, %5, %cst_7 {dimension_numbers = #tpu.dot_dimension_numbers<[2], [1], [1], [2], [0, 0, 0, 1, 1, 2], [0], [0]>} : vector<4x128x128xf32>, vector<4x128x128xf32>, vector<4x128x128xf32> -> vector<4x128x128xf32>
    "tpu.trace_stop"() : () -> ()
    %cst_8 = arith.constant 0.000000e+00 : f32
    %7 = vector.broadcast %cst_8 : f32 to vector<4x128x128xf32>
    %8 = arith.maximumf %6, %7 : vector<4x128x128xf32>
    %9 = vector.shape_cast %8 : vector<4x128x128xf32> to vector<512x128xf32>
    %c0_9 = arith.constant 0 : index
    %c0_10 = arith.constant 0 : index
    %10 = vector.load %arg4[%c0_9, %c0_10] : memref<128x128xf32, #tpu.memory_space<vmem>>, vector<128x128xf32>
    %cst_11 = arith.constant dense<0.000000e+00> : vector<512x128xf32>
    %11 = tpu.matmul %9, %10, %cst_11 {dimension_numbers = #tpu.dot_dimension_numbers<[1], [0], [0], [1], [0, 0, 1, 1], [], []>} : vector<512x128xf32>, vector<128x128xf32>, vector<512x128xf32> -> vector<512x128xf32>
    %12 = vector.shape_cast %11 : vector<512x128xf32> to vector<4x128x128xf32>
    "tpu.trace_start"() <{level = 10 : i32, message = "gij,gjk->gik"}> : () -> ()
    %cst_12 = arith.constant dense<0.000000e+00> : vector<4x128x128xf32>
    %13 = tpu.matmul %0, %12, %cst_12 {dimension_numbers = #tpu.dot_dimension_numbers<[2], [1], [1], [2], [0, 0, 0, 1, 1, 2], [0], [0]>} : vector<4x128x128xf32>, vector<4x128x128xf32>, vector<4x128x128xf32> -> vector<4x128x128xf32>
    "tpu.trace_stop"() : () -> ()
    %cst_13 = arith.constant 0.000000e+00 : f32
    %14 = vector.broadcast %cst_13 : f32 to vector<4x128x128xf32>
    %15 = arith.maximumf %13, %14 : vector<4x128x128xf32>
    %c0_14 = arith.constant 0 : index
    %c0_15 = arith.constant 0 : index
    %c0_16 = arith.constant 0 : index
    %16 = vector.load %arg5[%c0_14, %c0_15, %c0_16] : memref<4x128x128xf32, #tpu.memory_space<vmem>>, vector<4x128x128xf32>
    tpu.vector_store %arg5[%c0_14, %c0_15, %c0_16], %15 {strides = array<i32>} : memref<4x128x128xf32, #tpu.memory_space<vmem>>, vector<4x128x128xf32>,
    return
  }
  func.func @transform_0(%arg0: i32) -> (i32, i32, i32) {
    %c0_i32 = arith.constant 0 : i32
    %c0_i32_0 = arith.constant 0 : i32
    %c0_i32_1 = arith.constant 0 : i32
    return %arg0, %c0_i32, %c0_i32_0 : i32, i32, i32
  }
  func.func @transform_1(%arg0: i32) -> (i32, i32, i32) {
    %c0_i32 = arith.constant 0 : i32
    %c0_i32_0 = arith.constant 0 : i32
    %c0_i32_1 = arith.constant 0 : i32
    return %arg0, %c0_i32, %c0_i32_0 : i32, i32, i32
  }
  func.func @transform_2(%arg0: i32) -> (i32, i32) {
    %c0_i32 = arith.constant 0 : i32
    %c0_i32_0 = arith.constant 0 : i32
    %c0_i32_1 = arith.constant 0 : i32
    return %c0_i32, %c0_i32_0 : i32, i32
  }
  func.func @transform_3(%arg0: i32) -> (i32, i32) {
    %c0_i32 = arith.constant 0 : i32
    %c0_i32_0 = arith.constant 0 : i32
    %c0_i32_1 = arith.constant 0 : i32
    return %c0_i32, %c0_i32_0 : i32, i32
  }
  func.func @transform_4(%arg0: i32) -> (i32, i32, i32) {
    %c0_i32 = arith.constant 0 : i32
    %c0_i32_0 = arith.constant 0 : i32
    %c0_i32_1 = arith.constant 0 : i32
    return %arg0, %c0_i32, %c0_i32_0 : i32, i32, i32
  }
}

</mosaic_0001>

<bundles_post_ra>
// kernel: tpu_custom_call.1
= control target key start
LH: loop header
LB: loop body
LE: loop exit
PB: predicated region body
PF: predicated region fallthrough
CT: control target
= control target key end

     0   :  { %9 = vsyncpa [#allocation3], 0  ;;  %s4316_s0 = inlined_call_operand.hbm [shape: f32[4,128,128], index: 0, kind: input, shape index: {}]   ;;  %s4317_s1 = inlined_call_operand.hbm [shape: f32[4,128,128], index: 1, kind: input, shape index: {}]   ;;  %s4318_s2 = inlined_call_operand.hbm [shape: f32[128,128], index: 2, kind: input, shape index: {}]   ;;  %s4319_s3 = inlined_call_operand.hbm [shape: f32[128,128], index: 3, kind: input, shape index: {}]   ;;  %s4320_s4 = inlined_call_operand.hbm [shape: f32[4,128,128], index: 4, kind: output, shape index: {}]  }
   0x1   :  { %10 = vsyncpa [#allocation6], 0 }
   0x2   :  { %11 = vsyncpa [#allocation9], 0 }
   0x3   :  { %12 = vsyncpa [#allocation4], 0  ;;  %s3939_s15 = smov [#allocation5]   ;;  %s3940_s17 = smov [#allocation2]  }
   0x4   :  { %s30_s16 = sshll.u32 %s3939_s15, 4  ;;  %s18_s18 = sshll.u32 %s3940_s17, 4  ;;  %s31_s16 = int_to_ptr.vmem [resolvable:$true] %s30_s16  ;;  %s3971_s18 = int_to_ptr.vmem [resolvable:$true] %s18_s18 }
   0x5   :  { %s3821_s21 = scalar_lea.hbm %s4317_s1, 8192 }
   0x6   :  { %p3822_p0 = scmp.ne.s32.totalorder %s4317_s1, %s3821_s21  ;;  %p3825_p1 = scmp.lt.u32.totalorder %s3821_s21, %s4317_s1 }
   0x8   :  { %p3827_p2 = pnand %p3825_p1, %p3822_p0 }
   0xa   :  { %3830 = shalt.err (!%p3827_p2)
}
   0xb   :  { %s3831_s26 = scalar_lea.vmem %s31_s16, 8192  ;;  %p3836_p4 = scmp.lt.s32.totalorder %s31_s16, %s31_s16 }
   0xc   :  { %p3832_p3 = scmp.ne.s32.totalorder %s31_s16, %s3831_s26  ;;  %p3837_p5 = scmp.lt.s32.totalorder %s3831_s26, %s3831_s26 }
   0xe   :  { %p3838_p6 = por %p3837_p5, %p3836_p4 }
  0x10   :  { %p3839_p7 = pnand %p3838_p6, %p3832_p3 }
  0x12   :  { %3842 = shalt.err (!%p3839_p7)
}
  0x13   :  { %s3941_s27 = smov 128   ;;  %s3942_s28 = smov 8  }
  0x14   :  { %36 = dma.hbm_to_vmem [thread:$0]  %s4317_s1, 8192, %s31_s16, [#allocation6], %s3941_s27, %s3941_s27, %s3942_s28  }
  0x15   :  { %s3843_s7 = scalar_lea.hbm %s4316_s0, 8192 }
  0x16   :  { %p3844_p8 = scmp.ne.s32.totalorder %s4316_s0, %s3843_s7  ;;  %p3847_p9 = scmp.lt.u32.totalorder %s3843_s7, %s4316_s0 }
  0x18   :  { %p3849_p10 = pnand %p3847_p9, %p3844_p8 }
  0x1a   :  { %3852 = shalt.err (!%p3849_p10)
}
  0x1b   :  { %s3853_s12 = scalar_lea.vmem %s3971_s18, 8192  ;;  %p3858_p12 = scmp.lt.s32.totalorder %s3971_s18, %s3971_s18 }
  0x1c   :  { %p3854_p11 = scmp.ne.s32.totalorder %s3971_s18, %s3853_s12  ;;  %p3859_p13 = scmp.lt.s32.totalorder %s3853_s12, %s3853_s12 }
  0x1e   :  { %p3860_p0 = por %p3859_p13, %p3858_p12 }
  0x20   :  { %p3861_p1 = pnand %p3860_p0, %p3854_p11 }
  0x22   :  { %3864 = shalt.err (!%p3861_p1)
}
  0x23   :  { %24 = dma.hbm_to_vmem [thread:$0]  %s4316_s0, 8192, %s3971_s18, [#allocation3], %s3941_s27, %s3941_s27, %s3942_s28  }
  0x24   :  { %s3943_s14 = smov [#allocation7]   ;;  %s3944_s16 = smov [#allocation8]  }
  0x25   :  { %s42_s15 = sshll.u32 %s3943_s14, 4  ;;  %s54_s17 = sshll.u32 %s3944_s16, 4  ;;  %s43_s15 = int_to_ptr.vmem [resolvable:$true] %s42_s15  ;;  %s4008_s17 = int_to_ptr.vmem [resolvable:$true] %s54_s17 }
  0x26   :  { %s3865_s21 = scalar_lea.hbm %s4318_s2, 2048 }
  0x27   :  { %p3866_p2 = scmp.ne.s32.totalorder %s4318_s2, %s3865_s21  ;;  %p3869_p3 = scmp.lt.u32.totalorder %s3865_s21, %s4318_s2 }
  0x29   :  { %p3871_p4 = pnand %p3869_p3, %p3866_p2 }
  0x2b   :  { %3874 = shalt.err (!%p3871_p4)
}
  0x2c   :  { %s3875_s0 = scalar_lea.vmem %s43_s15, 2048  ;;  %p3880_p6 = scmp.lt.s32.totalorder %s43_s15, %s43_s15 }
  0x2d   :  { %p3876_p5 = scmp.ne.s32.totalorder %s43_s15, %s3875_s0  ;;  %p3881_p7 = scmp.lt.s32.totalorder %s3875_s0, %s3875_s0 }
  0x2f   :  { %p3882_p8 = por %p3881_p7, %p3880_p6 }
  0x31   :  { %p3883_p9 = pnand %p3882_p8, %p3876_p5 }
  0x33   :  { %3886 = shalt.err (!%p3883_p9)
}
  0x34   :  { %48 = dma.hbm_to_vmem [thread:$0]  %s4318_s2, 2048, %s43_s15, [#allocation6], %s3941_s27, %s3941_s27, %s3942_s28  }
  0x35   :  { %s3887_s5 = scalar_lea.hbm %s4319_s3, 2048 }
  0x36   :  { %p3888_p10 = scmp.ne.s32.totalorder %s4319_s3, %s3887_s5  ;;  %p3891_p11 = scmp.lt.u32.totalorder %s3887_s5, %s4319_s3 }
  0x38   :  { %p3893_p12 = pnand %p3891_p11, %p3888_p10 }
  0x3a   :  { %3896 = shalt.err (!%p3893_p12)
}
  0x3b   :  { %s3897_s10 = scalar_lea.vmem %s4008_s17, 2048  ;;  %p3902_p0 = scmp.lt.s32.totalorder %s4008_s17, %s4008_s17 }
  0x3c   :  { %p3898_p13 = scmp.ne.s32.totalorder %s4008_s17, %s3897_s10  ;;  %p3903_p1 = scmp.lt.s32.totalorder %s3897_s10, %s3897_s10 }
  0x3e   :  { %p3904_p2 = por %p3903_p1, %p3902_p0 }
  0x40   :  { %p3905_p3 = pnand %p3904_p2, %p3898_p13 }
  0x42   :  { %3908 = shalt.err (!%p3905_p3)
}
  0x43   :  { %60 = dma.hbm_to_vmem [thread:$0]  %s4319_s3, 2048, %s4008_s17, [#allocation9], %s3941_s27, %s3941_s27, %s3942_s28  }
  0x44   :  { %3931 = dma.done.wait [#allocation3], 8192  }
  0x45   :  { %3932 = vsyncadd [#allocation3], 4294959104 }
  0x46   :  { %3933 = dma.done.wait [#allocation6], 10240  }
  0x47   :  { %3934 = vsyncadd [#allocation6], 4294957056 }
  0x48   :  { %3935 = dma.done.wait [#allocation9], 2048  }
  0x49   :  { %3936 = vsyncadd [#allocation9], 4294965248  ;;  %v201_v0 = vld [vmem:[#allocation7] sm:$0xff]  ;;  %v202_v1 = vld [vmem:[#allocation7 + $0x8] sm:$0xff]  ;;  %s3945_s3 = smov [#allocation10]  }
  0x4a   :  { %v203_v2 = vld [vmem:[#allocation7 + $0x10] sm:$0xff]  ;;  %v3494_v3 = vpack.c.bf16 %v202_v1, %v201_v0  ;;  %v204_v4 = vld [vmem:[#allocation7 + $0x18] sm:$0xff]  ;;  %v205_v6 = vld [vmem:[#allocation7 + $0x20] sm:$0xff]  ;;  %s2360_s12 = sshll.u32 %s3945_s3, 4  ;;  %s2361_s12 = int_to_ptr.vmem [resolvable:$true] %s2360_s12 }
  0x4b   :  { %v3498_v5 = vpack.c.bf16 %v204_v4, %v203_v2  ;;  %v206_v7 = vld [vmem:[#allocation7 + $0x28] sm:$0xff]  ;;  %v137_v9 = vld [vmem:[#allocation5] sm:$0xff]  ;;  %v207_v10 = vld [vmem:[#allocation7 + $0x30] sm:$0xff]  ;;  %s3909_s1 = scalar_lea.vmem %s2361_s12, 8192  ;;  %p3914_p5 = scmp.lt.s32.totalorder %s2361_s12, %s2361_s12 }
  0x4c   :  { %3495 = vmatprep.subr.bf16.mxu0 %v3494_v3  ;;  %v3502_v8 = vpack.c.bf16 %v206_v7, %v205_v6  ;;  %v208_v11 = vld [vmem:[#allocation7 + $0x38] sm:$0xff]  ;;  %2822 = vmatprep.mubr.f32.mxu0 %v137_v9  ;;  %v209_v13 = vld [vmem:[#allocation7 + $0x40] sm:$0xff]  ;;  %v210_v14 = vld [vmem:[#allocation7 + $0x48] sm:$0xff]  ;;  %p3910_p4 = scmp.ne.s32.totalorder %s2361_s12, %s3909_s1  ;;  %p3915_p6 = scmp.lt.s32.totalorder %s3909_s1, %s3909_s1 }
  0x4d   :  { %3497 = vmatpush3.bf16.msra.mxu0 %v3494_v3  ;;  %v3506_v12 = vpack.c.bf16 %v208_v11, %v207_v10  ;;  %v3510_v15 = vpack.c.bf16 %v210_v14, %v209_v13  ;;  %v211_v16 = vld [vmem:[#allocation7 + $0x50] sm:$0xff]  ;;  %v212_v17 = vld [vmem:[#allocation7 + $0x58] sm:$0xff]  ;;  %v213_v19 = vld [vmem:[#allocation7 + $0x60] sm:$0xff] }
  0x4e   :  { %3499 = vmatprep.subr.bf16.mxu0 %v3498_v5  ;;  %v3514_v18 = vpack.c.bf16 %v212_v17, %v211_v16  ;;  %v214_v20 = vld [vmem:[#allocation7 + $0x68] sm:$0xff]  ;;  %v215_v22 = vld [vmem:[#allocation7 + $0x70] sm:$0xff]  ;;  %v216_v23 = vld [vmem:[#allocation7 + $0x78] sm:$0xff]  ;;  %p3916_p7 = por %p3915_p6, %p3914_p5 }
  0x4f   :  { %v3518_v21 = vpack.c.bf16 %v214_v20, %v213_v19  ;;  %v3522_v24 = vpack.c.bf16 %v216_v23, %v215_v22  ;;  %v138_v25 = vld [vmem:[#allocation5 + $0x8] sm:$0xff]  ;;  %v139_v26 = vld [vmem:[#allocation5 + $0x10] sm:$0xff]  ;;  %v140_v27 = vld [vmem:[#allocation5 + $0x18] sm:$0xff] }
  0x50   :  { %v141_v28 = vld [vmem:[#allocation5 + $0x20] sm:$0xff]  ;;  %v142_v29 = vld [vmem:[#allocation5 + $0x28] sm:$0xff]  ;;  %v143_v30 = vld [vmem:[#allocation5 + $0x30] sm:$0xff]  ;;  %p3917_p8 = pnand %p3916_p7, %p3910_p4 }
  0x51   :  { %3501 = vmatpush3.bf16.msra.mxu0 %v3498_v5  ;;  %v144_v31 = vld [vmem:[#allocation5 + $0x38] sm:$0xff]  ;;  %v145_v32 = vld [vmem:[#allocation5 + $0x40] sm:$0xff]  ;;  %v146_v33 = vld [vmem:[#allocation5 + $0x48] sm:$0xff] }
  0x52   :  { %3503 = vmatprep.subr.bf16.mxu0 %v3502_v8  ;;  %v147_v34 = vld [vmem:[#allocation5 + $0x50] sm:$0xff]  ;;  %v148_v35 = vld [vmem:[#allocation5 + $0x58] sm:$0xff]  ;;  %v149_v36 = vld [vmem:[#allocation5 + $0x60] sm:$0xff] }
  0x53   :  { %v150_v37 = vld [vmem:[#allocation5 + $0x68] sm:$0xff]  ;;  %v151_v38 = vld [vmem:[#allocation5 + $0x70] sm:$0xff]  ;;  %v152_v39 = vld [vmem:[#allocation5 + $0x78] sm:$0xff] }
  0x54   :  { %v153_v40 = vld [vmem:[#allocation5 + $0x80] sm:$0xff]  ;;  %v154_v41 = vld [vmem:[#allocation5 + $0x88] sm:$0xff]  ;;  %v155_v42 = vld [vmem:[#allocation5 + $0x90] sm:$0xff] }
  0x55   :  { %3505 = vmatpush3.bf16.msra.mxu0 %v3502_v8  ;;  %v156_v43 = vld [vmem:[#allocation5 + $0x98] sm:$0xff]  ;;  %v157_v44 = vld [vmem:[#allocation5 + $0xa0] sm:$0xff]  ;;  %v158_v45 = vld [vmem:[#allocation5 + $0xa8] sm:$0xff] }
  0x56   :  { %3507 = vmatprep.subr.bf16.mxu0 %v3506_v12  ;;  %v159_v46 = vld [vmem:[#allocation5 + $0xb0] sm:$0xff]  ;;  %v160_v47 = vld [vmem:[#allocation5 + $0xb8] sm:$0xff]  ;;  %v161_v48 = vld [vmem:[#allocation5 + $0xc0] sm:$0xff] }
  0x57   :  { %v162_v49 = vld [vmem:[#allocation5 + $0xc8] sm:$0xff]  ;;  %v163_v50 = vld [vmem:[#allocation5 + $0xd0] sm:$0xff]  ;;  %v164_v51 = vld [vmem:[#allocation5 + $0xd8] sm:$0xff] }
  0x58   :  { %v165_v52 = vld [vmem:[#allocation5 + $0xe0] sm:$0xff]  ;;  %v166_v53 = vld [vmem:[#allocation5 + $0xe8] sm:$0xff]  ;;  %v167_v54 = vld [vmem:[#allocation5 + $0xf0] sm:$0xff] }
  0x59   :  { %3509 = vmatpush3.bf16.msra.mxu0 %v3506_v12  ;;  %v168_v55 = vld [vmem:[#allocation5 + $0xf8] sm:$0xff]  ;;  %v169_v56 = vld [vmem:[#allocation5 + $0x100] sm:$0xff]  ;;  %v170_v57 = vld [vmem:[#allocation5 + $0x108] sm:$0xff] }
  0x5a   :  { %3511 = vmatprep.subr.bf16.mxu0 %v3510_v15  ;;  %v171_v58 = vld [vmem:[#allocation5 + $0x110] sm:$0xff]  ;;  %v172_v59 = vld [vmem:[#allocation5 + $0x118] sm:$0xff]  ;;  %v173_v60 = vld [vmem:[#allocation5 + $0x120] sm:$0xff] }
  0x5b   :  { %v174_v61 = vld [vmem:[#allocation5 + $0x128] sm:$0xff]  ;;  %v175_v62 = vld [vmem:[#allocation5 + $0x130] sm:$0xff]  ;;  %v176_v63 = vld [vmem:[#allocation5 + $0x138] sm:$0xff] }
  0x5c   :  { %v177_v0 = vld [vmem:[#allocation5 + $0x140] sm:$0xff]  ;;  %v178_v1 = vld [vmem:[#allocation5 + $0x148] sm:$0xff]  ;;  %v179_v2 = vld [vmem:[#allocation5 + $0x150] sm:$0xff] }
  0x5d   :  { %3513 = vmatpush3.bf16.msra.mxu0 %v3510_v15  ;;  %v180_v3 = vld [vmem:[#allocation5 + $0x158] sm:$0xff]  ;;  %v181_v4 = vld [vmem:[#allocation5 + $0x160] sm:$0xff]  ;;  %v182_v5 = vld [vmem:[#allocation5 + $0x168] sm:$0xff] }
  0x5e   :  { %3515 = vmatprep.subr.bf16.mxu0 %v3514_v18  ;;  %v183_v6 = vld [vmem:[#allocation5 + $0x170] sm:$0xff]  ;;  %v184_v7 = vld [vmem:[#allocation5 + $0x178] sm:$0xff]  ;;  %v185_v8 = vld [vmem:[#allocation5 + $0x180] sm:$0xff] }
  0x5f   :  { %v186_v9 = vld [vmem:[#allocation5 + $0x188] sm:$0xff]  ;;  %v187_v10 = vld [vmem:[#allocation5 + $0x190] sm:$0xff]  ;;  %v188_v11 = vld [vmem:[#allocation5 + $0x198] sm:$0xff] }
  0x60   :  { %v189_v12 = vld [vmem:[#allocation5 + $0x1a0] sm:$0xff]  ;;  %v190_v13 = vld [vmem:[#allocation5 + $0x1a8] sm:$0xff]  ;;  %v191_v14 = vld [vmem:[#allocation5 + $0x1b0] sm:$0xff] }
  0x61   :  { %3517 = vmatpush3.bf16.msra.mxu0 %v3514_v18  ;;  %v192_v15 = vld [vmem:[#allocation5 + $0x1b8] sm:$0xff]  ;;  %v193_v16 = vld [vmem:[#allocation5 + $0x1c0] sm:$0xff]  ;;  %v194_v17 = vld [vmem:[#allocation5 + $0x1c8] sm:$0xff] }
  0x62   :  { %3519 = vmatprep.subr.bf16.mxu0 %v3518_v21  ;;  %v195_v18 = vld [vmem:[#allocation5 + $0x1d0] sm:$0xff]  ;;  %v196_v19 = vld [vmem:[#allocation5 + $0x1d8] sm:$0xff]  ;;  %v197_v20 = vld [vmem:[#allocation5 + $0x1e0] sm:$0xff] }
  0x63   :  { %v4045_v22 = vld [vmem:[#allocation2] sm:$0xff]  ;;  %v199_v23 = vld [vmem:[#allocation5 + $0x1f0] sm:$0xff] }
  0x64   :  { %2950 = vmatprep.mubr.f32.mxu1 %v4045_v22 }
  0x65   :  { %3521 = vmatpush3.bf16.msra.mxu0 %v3518_v21  ;;  %v198_v21 = vld [vmem:[#allocation5 + $0x1e8] sm:$0xff] }
  0x66   :  { %3523 = vmatprep.subr.bf16.mxu0 %v3522_v24 }
  0x69   :  { %3525 = vmatpush3.bf16.msra.mxu0 %v3522_v24  ;;  %v200_v24 = vld [vmem:[#allocation5 + $0x1f8] sm:$0xff] }
  0x6c   :  { %2823 = vmatmul.mubr.f32.vlgmr.msra.gmra.mrb[0].mxu0 %v138_v25  ;;  %v1246_v25 = vld [vmem:[#allocation8] sm:$0xff] }
  0x6d   :  { %2825 = vmatprep.mubr.f32.mxu0 %v139_v26  ;;  %v1247_v26 = vld [vmem:[#allocation8 + $0x8] sm:$0xff] }
  0x70   :  { %2826 = vmatmul.mubr.f32.gmra.mrb[2].mxu0 %v140_v27  ;;  %v3654_v27 = vpack.c.bf16 %v1247_v26, %v1246_v25  ;;  %v4066_v26 = vld [vmem:[#allocation2 + $0x38] sm:$0xff] }
  0x71   :  { %2828 = vmatprep.mubr.f32.mxu0 %v141_v28 }
  0x72   :  { %3655 = vmatprep.subr.bf16.mxu0 %v3654_v27 }
  0x73   :  { %3657 = vmatpush3.bf16.msra.mxu0 %v3654_v27 }
  0x74   :  { %2829 = vmatmul.mubr.f32.gmra.mrb[4].mxu0 %v142_v29 }
  0x75   :  { %2831 = vmatprep.mubr.f32.mxu0 %v143_v30 }
  0x78   :  { %2832 = vmatmul.mubr.f32.gmra.mrb[6].mxu0 %v144_v31 }
  0x79   :  { %2834 = vmatprep.mubr.f32.mxu0 %v145_v32 }
  0x7c   :  { %2835 = vmatmul.mubr.f32.gmra.mrb[8].mxu0 %v146_v33 }
  0x7d   :  { %2837 = vmatprep.mubr.f32.mxu0 %v147_v34 }
  0x80   :  { %2838 = vmatmul.mubr.f32.gmra.mrb[10].mxu0 %v148_v35 }
  0x81   :  { %2840 = vmatprep.mubr.f32.mxu0 %v149_v36 }
  0x84   :  { %2841 = vmatmul.mubr.f32.gmra.mrb[12].mxu0 %v150_v37 }
  0x85   :  { %2843 = vmatprep.mubr.f32.mxu0 %v151_v38  ;;  %v1248_v38 = vld [vmem:[#allocation8 + $0x10] sm:$0xff] }
  0x88   :  { %2844 = vmatmul.mubr.f32.gmra.mrb[14].mxu0 %v152_v39  ;;  %v1249_v39 = vld [vmem:[#allocation8 + $0x18] sm:$0xff] }
  0x89   :  { %2846 = vmatprep.mubr.f32.mxu0 %v153_v40 }
  0x8c   :  { %2847 = vmatmul.mubr.f32.gmra.mrb[16].mxu0 %v154_v41  ;;  %v3658_v41 = vpack.c.bf16 %v1249_v39, %v1248_v38  ;;  %v4080_v39 = vld [vmem:[#allocation2 + $0x60] sm:$0xff] }
  0x8d   :  { %2849 = vmatprep.mubr.f32.mxu0 %v155_v42 }
  0x8e   :  { %3659 = vmatprep.subr.bf16.mxu0 %v3658_v41 }
  0x8f   :  { %3661 = vmatpush3.bf16.msra.mxu0 %v3658_v41 }
  0x90   :  { %2850 = vmatmul.mubr.f32.gmra.mrb[18].mxu0 %v156_v43 }
  0x91   :  { %2852 = vmatprep.mubr.f32.mxu0 %v157_v44 }
  0x94   :  { %2853 = vmatmul.mubr.f32.gmra.mrb[20].mxu0 %v158_v45 }
  0x95   :  { %2855 = vmatprep.mubr.f32.mxu0 %v159_v46 }
  0x98   :  { %2856 = vmatmul.mubr.f32.gmra.mrb[22].mxu0 %v160_v47 }
  0x99   :  { %2858 = vmatprep.mubr.f32.mxu0 %v161_v48 }
  0x9c   :  { %2859 = vmatmul.mubr.f32.gmra.mrb[24].mxu0 %v162_v49 }
  0x9d   :  { %2861 = vmatprep.mubr.f32.mxu0 %v163_v50 }
  0xa0   :  { %2862 = vmatmul.mubr.f32.gmra.mrb[26].mxu0 %v164_v51 }
  0xa1   :  { %2864 = vmatprep.mubr.f32.mxu0 %v165_v52 }
  0xa4   :  { %2865 = vmatmul.mubr.f32.gmra.mrb[28].mxu0 %v166_v53  ;;  %v1250_v53 = vld [vmem:[#allocation8 + $0x20] sm:$0xff] }
  0xa5   :  { %2867 = vmatprep.mubr.f32.mxu0 %v167_v54  ;;  %v1251_v54 = vld [vmem:[#allocation8 + $0x28] sm:$0xff] }
  0xa8   :  { %2868 = vmatmul.mubr.f32.gmra.mrb[30].mxu0 %v168_v55 }
  0xa9   :  { %2870 = vmatprep.mubr.f32.mxu0 %v169_v56  ;;  %v3662_v56 = vpack.c.bf16 %v1251_v54, %v1250_v53  ;;  %v4098_v54 = vld [vmem:[#allocation2 + $0x90] sm:$0xff] }
  0xab   :  { %3663 = vmatprep.subr.bf16.mxu0 %v3662_v56 }
  0xac   :  { %2871 = vmatmul.mubr.f32.gmra.mrb[32].mxu0 %v170_v57 }
  0xad   :  { %2873 = vmatprep.mubr.f32.mxu0 %v171_v58  ;;  %3665 = vmatpush3.bf16.msra.mxu0 %v3662_v56 }
  0xb0   :  { %2874 = vmatmul.mubr.f32.gmra.mrb[34].mxu0 %v172_v59  ;;  %v1252_v59 = vld [vmem:[#allocation8 + $0x30] sm:$0xff] }
  0xb1   :  { %2876 = vmatprep.mubr.f32.mxu0 %v173_v60  ;;  %v1253_v60 = vld [vmem:[#allocation8 + $0x38] sm:$0xff] }
  0xb4   :  { %2877 = vmatmul.mubr.f32.gmra.mrb[36].mxu0 %v174_v61  ;;  %v1254_v61 = vld [vmem:[#allocation8 + $0x40] sm:$0xff] }
  0xb5   :  { %2879 = vmatprep.mubr.f32.mxu0 %v175_v62 }
  0xb8   :  { %2880 = vmatmul.mubr.f32.gmra.mrb[38].mxu0 %v176_v63  ;;  %v4048_v63 = vld [vmem:[#allocation2 + $0x8] sm:$0xff] }
  0xb9   :  { %2882 = vmatprep.mubr.f32.mxu0 %v177_v0  ;;  %v3666_v0 = vpack.c.bf16 %v1253_v60, %v1252_v59  ;;  %v4104_v59 = vld [vmem:[#allocation2 + $0xa0] sm:$0xff] }
  0xbb   :  { %3667 = vmatprep.subr.bf16.mxu0 %v3666_v0 }
  0xbc   :  { %2883 = vmatmul.mubr.f32.gmra.mrb[40].mxu0 %v178_v1  ;;  %v1255_v1 = vld [vmem:[#allocation8 + $0x48] sm:$0xff] }
  0xbd   :  { %2885 = vmatprep.mubr.f32.mxu0 %v179_v2  ;;  %3669 = vmatpush3.bf16.msra.mxu0 %v3666_v0 }
  0xc0   :  { %2886 = vmatmul.mubr.f32.gmra.mrb[42].mxu0 %v180_v3  ;;  %v4050_v3 = vld [vmem:[#allocation2 + $0x10] sm:$0xff] }
  0xc1   :  { %2888 = vmatprep.mubr.f32.mxu0 %v181_v4  ;;  %v3670_v4 = vpack.c.bf16 %v1255_v1, %v1254_v61  ;;  %v4110_v1 = vld [vmem:[#allocation2 + $0xb0] sm:$0xff] }
  0xc3   :  { %3671 = vmatprep.subr.bf16.mxu0 %v3670_v4 }
  0xc4   :  { %2889 = vmatmul.mubr.f32.gmra.mrb[44].mxu0 %v182_v5 }
  0xc5   :  { %2891 = vmatprep.mubr.f32.mxu0 %v183_v6  ;;  %v1256_v6 = vld [vmem:[#allocation8 + $0x50] sm:$0xff]  ;;  %3673 = vmatpush3.bf16.msra.mxu0 %v3670_v4 }
  0xc8   :  { %2892 = vmatmul.mubr.f32.gmra.mrb[46].mxu0 %v184_v7  ;;  %v1257_v7 = vld [vmem:[#allocation8 + $0x58] sm:$0xff] }
  0xc9   :  { %2894 = vmatprep.mubr.f32.mxu0 %v185_v8 }
  0xcc   :  { %2895 = vmatmul.mubr.f32.gmra.mrb[48].mxu0 %v186_v9  ;;  %v4054_v9 = vld [vmem:[#allocation2 + $0x18] sm:$0xff] }
  0xcd   :  { %2897 = vmatprep.mubr.f32.mxu0 %v187_v10 }
  0xd0   :  { %2898 = vmatmul.mubr.f32.gmra.mrb[50].mxu0 %v188_v11  ;;  %v4056_v11 = vld [vmem:[#allocation2 + $0x20] sm:$0xff] }
  0xd1   :  { %2900 = vmatprep.mubr.f32.mxu0 %v189_v12  ;;  %v3674_v12 = vpack.c.bf16 %v1257_v7, %v1256_v6  ;;  %v4116_v7 = vld [vmem:[#allocation2 + $0xc0] sm:$0xff] }
  0xd3   :  { %3675 = vmatprep.subr.bf16.mxu0 %v3674_v12 }
  0xd4   :  { %2901 = vmatmul.mubr.f32.gmra.mrb[52].mxu0 %v190_v13 }
  0xd5   :  { %2903 = vmatprep.mubr.f32.mxu0 %v191_v14  ;;  %v1258_v14 = vld [vmem:[#allocation8 + $0x60] sm:$0xff]  ;;  %3677 = vmatpush3.bf16.msra.mxu0 %v3674_v12  ;;  %v4120_v12 = vld [vmem:[#allocation2 + $0xc8] sm:$0xff] }
  0xd8   :  { %2904 = vmatmul.mubr.f32.gmra.mrb[54].mxu0 %v192_v15  ;;  %v1259_v15 = vld [vmem:[#allocation8 + $0x68] sm:$0xff] }
  0xd9   :  { %2906 = vmatprep.mubr.f32.mxu0 %v193_v16 }
  0xdc   :  { %2907 = vmatmul.mubr.f32.gmra.mrb[56].mxu0 %v194_v17  ;;  %v4060_v17 = vld [vmem:[#allocation2 + $0x28] sm:$0xff] }
  0xdd   :  { %2909 = vmatprep.mubr.f32.mxu0 %v195_v18 }
  0xe0   :  { %2910 = vmatmul.mubr.f32.gmra.mrb[58].mxu0 %v196_v19  ;;  %v4062_v19 = vld [vmem:[#allocation2 + $0x30] sm:$0xff] }
  0xe1   :  { %2912 = vmatprep.mubr.f32.mxu0 %v197_v20  ;;  %v3678_v20 = vpack.c.bf16 %v1259_v15, %v1258_v14  ;;  %v4122_v14 = vld [vmem:[#allocation2 + $0xd0] sm:$0xff] }
  0xe3   :  { %3679 = vmatprep.subr.bf16.mxu0 %v3678_v20 }
  0xe4   :  { %2913 = vmatmul.mubr.f32.gmra.mrb[60].mxu0 %v198_v21 }
  0xe5   :  { %2915 = vmatprep.mubr.f32.mxu0 %v199_v23  ;;  %v1260_v23 = vld [vmem:[#allocation8 + $0x70] sm:$0xff]  ;;  %3681 = vmatpush3.bf16.msra.mxu0 %v3678_v20 }
  0xe8   :  { %2916 = vmatmul.mubr.f32.gmra.mrb[62].mxu0 %v200_v24  ;;  %v1261_v24 = vld [vmem:[#allocation8 + $0x78] sm:$0xff] }
 0x13f   :  { %v2824_v28 = vpop.f32.mrb[0].mxu0 }
 0x140   :  { %v283_v29 = vpop.f32.mrb[1].mxu0 }
 0x141   :  { %v3526_v30 = vpack.c.bf16 %v2824_v28, %v283_v29  ;;  %v4068_v28 = vld [vmem:[#allocation2 + $0x40] sm:$0xff]  ;;  %v3682_v29 = vpack.c.bf16 %v1261_v24, %v1260_v23 }
 0x143   :  { %v2827_v31 = vpop.f32.mrb[2].mxu0  ;;  %3527 = vmatprep.subr.bf16.mxu1 %v3526_v30  ;;  %3683 = vmatprep.subr.bf16.mxu0 %v3682_v29 }
 0x144   :  { %v293_v32 = vpop.f32.mrb[3].mxu0  ;;  %3529 = vmatpush3.bf16.msra.mxu1 %v3526_v30  ;;  %3685 = vmatpush3.bf16.msra.mxu0 %v3682_v29  ;;  %v4134_v29 = vld [vmem:[#allocation2 + $0xf0] sm:$0xff] }
 0x145   :  { %v3530_v33 = vpack.c.bf16 %v2827_v31, %v293_v32  ;;  %v4072_v32 = vld [vmem:[#allocation2 + $0x48] sm:$0xff] }
 0x147   :  { %v2830_v34 = vpop.f32.mrb[4].mxu0  ;;  %3531 = vmatprep.subr.bf16.mxu1 %v3530_v33 }
 0x148   :  { %v303_v35 = vpop.f32.mrb[5].mxu0  ;;  %3533 = vmatpush3.bf16.msra.mxu1 %v3530_v33 }
 0x149   :  { %v3534_v36 = vpack.c.bf16 %v2830_v34, %v303_v35  ;;  %v4074_v34 = vld [vmem:[#allocation2 + $0x50] sm:$0xff] }
 0x14b   :  { %v2833_v37 = vpop.f32.mrb[6].mxu0  ;;  %3535 = vmatprep.subr.bf16.mxu1 %v3534_v36 }
 0x14c   :  { %v313_v40 = vpop.f32.mrb[7].mxu0  ;;  %3537 = vmatpush3.bf16.msra.mxu1 %v3534_v36 }
 0x14d   :  { %v3538_v42 = vpack.c.bf16 %v2833_v37, %v313_v40  ;;  %v4078_v37 = vld [vmem:[#allocation2 + $0x58] sm:$0xff] }
 0x14f   :  { %v2836_v43 = vpop.f32.mrb[8].mxu0  ;;  %3539 = vmatprep.subr.bf16.mxu1 %v3538_v42 }
 0x150   :  { %v323_v44 = vpop.f32.mrb[9].mxu0  ;;  %3541 = vmatpush3.bf16.msra.mxu1 %v3538_v42  ;;  %v4084_v42 = vld [vmem:[#allocation2 + $0x68] sm:$0xff] }
 0x151   :  { %v3542_v45 = vpack.c.bf16 %v2836_v43, %v323_v44  ;;  %v4086_v44 = vld [vmem:[#allocation2 + $0x70] sm:$0xff] }
 0x153   :  { %v2839_v46 = vpop.f32.mrb[10].mxu0  ;;  %3543 = vmatprep.subr.bf16.mxu1 %v3542_v45 }
 0x154   :  { %v333_v47 = vpop.f32.mrb[11].mxu0  ;;  %3545 = vmatpush3.bf16.msra.mxu1 %v3542_v45 }
 0x155   :  { %v3546_v48 = vpack.c.bf16 %v2839_v46, %v333_v47  ;;  %v4090_v47 = vld [vmem:[#allocation2 + $0x78] sm:$0xff] }
 0x157   :  { %v2842_v49 = vpop.f32.mrb[12].mxu0  ;;  %3547 = vmatprep.subr.bf16.mxu1 %v3546_v48 }
 0x158   :  { %v343_v50 = vpop.f32.mrb[13].mxu0  ;;  %3549 = vmatpush3.bf16.msra.mxu1 %v3546_v48 }
 0x159   :  { %v3550_v51 = vpack.c.bf16 %v2842_v49, %v343_v50  ;;  %v4092_v49 = vld [vmem:[#allocation2 + $0x80] sm:$0xff] }
 0x15b   :  { %v2845_v52 = vpop.f32.mrb[14].mxu0  ;;  %3551 = vmatprep.subr.bf16.mxu1 %v3550_v51 }
 0x15c   :  { %v353_v55 = vpop.f32.mrb[15].mxu0  ;;  %3553 = vmatpush3.bf16.msra.mxu1 %v3550_v51 }
 0x15d   :  { %v3554_v57 = vpack.c.bf16 %v2845_v52, %v353_v55  ;;  %v4096_v52 = vld [vmem:[#allocation2 + $0x88] sm:$0xff] }
 0x15f   :  { %v2848_v58 = vpop.f32.mrb[16].mxu0  ;;  %3555 = vmatprep.subr.bf16.mxu1 %v3554_v57 }
 0x160   :  { %v363_v62 = vpop.f32.mrb[17].mxu0  ;;  %3557 = vmatpush3.bf16.msra.mxu1 %v3554_v57  ;;  %v4102_v57 = vld [vmem:[#allocation2 + $0x98] sm:$0xff] }
 0x161   :  { %v3558_v2 = vpack.c.bf16 %v2848_v58, %v363_v62  ;;  %v4108_v62 = vld [vmem:[#allocation2 + $0xa8] sm:$0xff] }
 0x163   :  { %v2851_v5 = vpop.f32.mrb[18].mxu0  ;;  %2951 = vmatmul.mubr.f32.vlgmr.msra.gmra.mrb[0].mxu1 %v4048_v63  ;;  %3559 = vmatprep.subr.bf16.mxu1 %v3558_v2 }
 0x164   :  { %v373_v8 = vpop.f32.mrb[19].mxu0  ;;  %3561 = vmatpush3.bf16.msra.mxu1 %v3558_v2  ;;  %2953 = vmatprep.mubr.f32.mxu1 %v4050_v3 }
 0x165   :  { %v3562_v10 = vpack.c.bf16 %v2851_v5, %v373_v8  ;;  %v4114_v5 = vld [vmem:[#allocation2 + $0xb8] sm:$0xff] }
 0x167   :  { %v2854_v13 = vpop.f32.mrb[20].mxu0  ;;  %2954 = vmatmul.mubr.f32.gmra.mrb[2].mxu1 %v4054_v9  ;;  %3563 = vmatprep.subr.bf16.mxu1 %v3562_v10 }
 0x168   :  { %v383_v16 = vpop.f32.mrb[21].mxu0  ;;  %3565 = vmatpush3.bf16.msra.mxu1 %v3562_v10  ;;  %2956 = vmatprep.mubr.f32.mxu1 %v4056_v11 }
 0x169   :  { %v3566_v18 = vpack.c.bf16 %v2854_v13, %v383_v16 }
 0x16b   :  { %v2857_v21 = vpop.f32.mrb[22].mxu0  ;;  %2957 = vmatmul.mubr.f32.gmra.mrb[4].mxu1 %v4060_v17  ;;  %3567 = vmatprep.subr.bf16.mxu1 %v3566_v18 }
 0x16c   :  { %v393_v25 = vpop.f32.mrb[23].mxu0  ;;  %3569 = vmatpush3.bf16.msra.mxu1 %v3566_v18  ;;  %2959 = vmatprep.mubr.f32.mxu1 %v4062_v19  ;;  %v4126_v18 = vld [vmem:[#allocation2 + $0xd8] sm:$0xff] }
 0x16d   :  { %v3570_v27 = vpack.c.bf16 %v2857_v21, %v393_v25  ;;  %v4128_v21 = vld [vmem:[#allocation2 + $0xe0] sm:$0xff]  ;;  %v4132_v25 = vld [vmem:[#allocation2 + $0xe8] sm:$0xff] }
 0x16f   :  { %v2860_v30 = vpop.f32.mrb[24].mxu0  ;;  %2960 = vmatmul.mubr.f32.gmra.mrb[6].mxu1 %v4066_v26  ;;  %3571 = vmatprep.subr.bf16.mxu1 %v3570_v27 }
 0x170   :  { %v403_v31 = vpop.f32.mrb[25].mxu0  ;;  %3573 = vmatpush3.bf16.msra.mxu1 %v3570_v27  ;;  %2962 = vmatprep.mubr.f32.mxu1 %v4068_v28 }
 0x171   :  { %v3574_v33 = vpack.c.bf16 %v2860_v30, %v403_v31 }
 0x173   :  { %v2863_v35 = vpop.f32.mrb[26].mxu0  ;;  %2963 = vmatmul.mubr.f32.gmra.mrb[8].mxu1 %v4072_v32  ;;  %3575 = vmatprep.subr.bf16.mxu1 %v3574_v33 }
 0x174   :  { %v413_v36 = vpop.f32.mrb[27].mxu0  ;;  %3577 = vmatpush3.bf16.msra.mxu1 %v3574_v33  ;;  %2965 = vmatprep.mubr.f32.mxu1 %v4074_v34  ;;  %v4138_v33 = vld [vmem:[#allocation2 + $0xf8] sm:$0xff] }
 0x175   :  { %v3578_v38 = vpack.c.bf16 %v2863_v35, %v413_v36  ;;  %v4140_v36 = vld [vmem:[#allocation2 + $0x100] sm:$0xff] }
 0x177   :  { %v2866_v40 = vpop.f32.mrb[28].mxu0  ;;  %2966 = vmatmul.mubr.f32.gmra.mrb[10].mxu1 %v4078_v37  ;;  %3579 = vmatprep.subr.bf16.mxu1 %v3578_v38 }
 0x178   :  { %v423_v41 = vpop.f32.mrb[29].mxu0  ;;  %3581 = vmatpush3.bf16.msra.mxu1 %v3578_v38  ;;  %2968 = vmatprep.mubr.f32.mxu1 %v4080_v39 }
 0x179   :  { %v3582_v43 = vpack.c.bf16 %v2866_v40, %v423_v41  ;;  %v4144_v41 = vld [vmem:[#allocation2 + $0x108] sm:$0xff] }
 0x17b   :  { %v2869_v45 = vpop.f32.mrb[30].mxu0  ;;  %2969 = vmatmul.mubr.f32.gmra.mrb[12].mxu1 %v4084_v42  ;;  %3583 = vmatprep.subr.bf16.mxu1 %v3582_v43 }
 0x17c   :  { %v433_v46 = vpop.f32.mrb[31].mxu0  ;;  %3585 = vmatpush3.bf16.msra.mxu1 %v3582_v43  ;;  %2971 = vmatprep.mubr.f32.mxu1 %v4086_v44 }
 0x17d   :  { %v3586_v48 = vpack.c.bf16 %v2869_v45, %v433_v46  ;;  %v4146_v45 = vld [vmem:[#allocation2 + $0x110] sm:$0xff] }
 0x17f   :  { %v2872_v50 = vpop.f32.mrb[32].mxu0  ;;  %2972 = vmatmul.mubr.f32.gmra.mrb[14].mxu1 %v4090_v47  ;;  %3587 = vmatprep.subr.bf16.mxu1 %v3586_v48 }
 0x180   :  { %v443_v51 = vpop.f32.mrb[33].mxu0  ;;  %3589 = vmatpush3.bf16.msra.mxu1 %v3586_v48  ;;  %3006 = vmatprep.mubr.f32.mxu1 %v4092_v49 }
 0x181   :  { %v3590_v53 = vpack.c.bf16 %v2872_v50, %v443_v51  ;;  %v4150_v50 = vld [vmem:[#allocation2 + $0x118] sm:$0xff] }
 0x183   :  { %v2875_v55 = vpop.f32.mrb[34].mxu0  ;;  %3007 = vmatmul.mubr.f32.vlgmr.msra.gmra.mrb[16].mxu1 %v4096_v52  ;;  %3591 = vmatprep.subr.bf16.mxu1 %v3590_v53 }
 0x184   :  { %v453_v56 = vpop.f32.mrb[35].mxu0  ;;  %3593 = vmatpush3.bf16.msra.mxu1 %v3590_v53  ;;  %3009 = vmatprep.mubr.f32.mxu1 %v4098_v54  ;;  %v4152_v53 = vld [vmem:[#allocation2 + $0x120] sm:$0xff] }
 0x185   :  { %v3594_v58 = vpack.c.bf16 %v2875_v55, %v453_v56 }
 0x187   :  { %v2878_v60 = vpop.f32.mrb[36].mxu0  ;;  %3010 = vmatmul.mubr.f32.gmra.mrb[18].mxu1 %v4102_v57  ;;  %3595 = vmatprep.subr.bf16.mxu1 %v3594_v58 }
 0x188   :  { %v463_v61 = vpop.f32.mrb[37].mxu0  ;;  %3597 = vmatpush3.bf16.msra.mxu1 %v3594_v58  ;;  %3012 = vmatprep.mubr.f32.mxu1 %v4104_v59  ;;  %v4156_v58 = vld [vmem:[#allocation2 + $0x128] sm:$0xff] }
 0x189   :  { %v3598_v0 = vpack.c.bf16 %v2878_v60, %v463_v61  ;;  %v4158_v61 = vld [vmem:[#allocation2 + $0x130] sm:$0xff] }
 0x18b   :  { %v2881_v2 = vpop.f32.mrb[38].mxu0  ;;  %3013 = vmatmul.mubr.f32.gmra.mrb[20].mxu1 %v4108_v62  ;;  %3599 = vmatprep.subr.bf16.mxu1 %v3598_v0 }
 0x18c   :  { %v473_v4 = vpop.f32.mrb[39].mxu0  ;;  %3601 = vmatpush3.bf16.msra.mxu1 %v3598_v0  ;;  %3015 = vmatprep.mubr.f32.mxu1 %v4110_v1 }
 0x18d   :  { %v3602_v6 = vpack.c.bf16 %v2881_v2, %v473_v4  ;;  %v4162_v4 = vld [vmem:[#allocation2 + $0x138] sm:$0xff] }
 0x18f   :  { %v2884_v8 = vpop.f32.mrb[40].mxu0  ;;  %3016 = vmatmul.mubr.f32.gmra.mrb[22].mxu1 %v4114_v5  ;;  %3603 = vmatprep.subr.bf16.mxu1 %v3602_v6 }
 0x190   :  { %v483_v10 = vpop.f32.mrb[41].mxu0  ;;  %3605 = vmatpush3.bf16.msra.mxu1 %v3602_v6  ;;  %3018 = vmatprep.mubr.f32.mxu1 %v4116_v7 }
 0x191   :  { %v3606_v13 = vpack.c.bf16 %v2884_v8, %v483_v10  ;;  %v4164_v8 = vld [vmem:[#allocation2 + $0x140] sm:$0xff] }
 0x193   :  { %v2887_v15 = vpop.f32.mrb[42].mxu0  ;;  %3019 = vmatmul.mubr.f32.gmra.mrb[24].mxu1 %v4120_v12  ;;  %3607 = vmatprep.subr.bf16.mxu1 %v3606_v13 }
 0x194   :  { %v493_v16 = vpop.f32.mrb[43].mxu0  ;;  %3609 = vmatpush3.bf16.msra.mxu1 %v3606_v13  ;;  %3021 = vmatprep.mubr.f32.mxu1 %v4122_v14 }
 0x195   :  { %v3610_v20 = vpack.c.bf16 %v2887_v15, %v493_v16  ;;  %v4168_v15 = vld [vmem:[#allocation2 + $0x148] sm:$0xff] }
 0x197   :  { %v2890_v23 = vpop.f32.mrb[44].mxu0  ;;  %3022 = vmatmul.mubr.f32.gmra.mrb[26].mxu1 %v4126_v18  ;;  %3611 = vmatprep.subr.bf16.mxu1 %v3610_v20 }
 0x198   :  { %v503_v24 = vpop.f32.mrb[45].mxu0  ;;  %3613 = vmatpush3.bf16.msra.mxu1 %v3610_v20  ;;  %3024 = vmatprep.mubr.f32.mxu1 %v4128_v21  ;;  %v4170_v20 = vld [vmem:[#allocation2 + $0x150] sm:$0xff] }
 0x199   :  { %v3614_v27 = vpack.c.bf16 %v2890_v23, %v503_v24 }
 0x19b   :  { %v2893_v30 = vpop.f32.mrb[46].mxu0  ;;  %3025 = vmatmul.mubr.f32.gmra.mrb[28].mxu1 %v4132_v25  ;;  %3615 = vmatprep.subr.bf16.mxu1 %v3614_v27 }
 0x19c   :  { %v513_v31 = vpop.f32.mrb[47].mxu0  ;;  %3617 = vmatpush3.bf16.msra.mxu1 %v3614_v27  ;;  %3027 = vmatprep.mubr.f32.mxu1 %v4134_v29  ;;  %v4174_v27 = vld [vmem:[#allocation2 + $0x158] sm:$0xff] }
 0x19d   :  { %v3618_v35 = vpack.c.bf16 %v2893_v30, %v513_v31  ;;  %v4176_v31 = vld [vmem:[#allocation2 + $0x160] sm:$0xff] }
 0x19f   :  { %v2896_v38 = vpop.f32.mrb[48].mxu0  ;;  %3028 = vmatmul.mubr.f32.gmra.mrb[30].mxu1 %v4138_v33  ;;  %3619 = vmatprep.subr.bf16.mxu1 %v3618_v35 }
 0x1a0   :  { %v523_v40 = vpop.f32.mrb[49].mxu0  ;;  %3621 = vmatpush3.bf16.msra.mxu1 %v3618_v35  ;;  %3062 = vmatprep.mubr.f32.mxu1 %v4140_v36 }
 0x1a1   :  { %v3622_v43 = vpack.c.bf16 %v2896_v38, %v523_v40  ;;  %v4180_v40 = vld [vmem:[#allocation2 + $0x168] sm:$0xff] }
 0x1a3   :  { %v2899_v46 = vpop.f32.mrb[50].mxu0  ;;  %3063 = vmatmul.mubr.f32.vlgmr.msra.gmra.mrb[32].mxu1 %v4144_v41  ;;  %3623 = vmatprep.subr.bf16.mxu1 %v3622_v43 }
 0x1a4   :  { %v533_v48 = vpop.f32.mrb[51].mxu0  ;;  %3625 = vmatpush3.bf16.msra.mxu1 %v3622_v43  ;;  %3065 = vmatprep.mubr.f32.mxu1 %v4146_v45 }
 0x1a5   :  { %v3626_v51 = vpack.c.bf16 %v2899_v46, %v533_v48  ;;  %v4182_v46 = vld [vmem:[#allocation2 + $0x170] sm:$0xff] }
 0x1a7   :  { %v2902_v55 = vpop.f32.mrb[52].mxu0  ;;  %3066 = vmatmul.mubr.f32.gmra.mrb[34].mxu1 %v4150_v50  ;;  %3627 = vmatprep.subr.bf16.mxu1 %v3626_v51 }
 0x1a8   :  { %v543_v56 = vpop.f32.mrb[53].mxu0  ;;  %3629 = vmatpush3.bf16.msra.mxu1 %v3626_v51  ;;  %3068 = vmatprep.mubr.f32.mxu1 %v4152_v53 }
 0x1a9   :  { %v3630_v60 = vpack.c.bf16 %v2902_v55, %v543_v56  ;;  %v4186_v55 = vld [vmem:[#allocation2 + $0x178] sm:$0xff] }
 0x1ab   :  { %v2905_v0 = vpop.f32.mrb[54].mxu0  ;;  %3069 = vmatmul.mubr.f32.gmra.mrb[36].mxu1 %v4156_v58  ;;  %3631 = vmatprep.subr.bf16.mxu1 %v3630_v60 }
 0x1ac   :  { %v553_v2 = vpop.f32.mrb[55].mxu0  ;;  %3633 = vmatpush3.bf16.msra.mxu1 %v3630_v60  ;;  %3071 = vmatprep.mubr.f32.mxu1 %v4158_v61  ;;  %v4188_v60 = vld [vmem:[#allocation2 + $0x180] sm:$0xff] }
 0x1ad   :  { %v3634_v6 = vpack.c.bf16 %v2905_v0, %v553_v2  ;;  %v4192_v0 = vld [vmem:[#allocation2 + $0x188] sm:$0xff]  ;;  %v4194_v2 = vld [vmem:[#allocation2 + $0x190] sm:$0xff] }
 0x1ae   :  { %4336 = vst [vmem:[#allocation15_spill] sm:$0xff] %v4192_v0  ;;  %4337 = vst [vmem:[#allocation16_spill] sm:$0xff] %v4194_v2 }
 0x1af   :  { %v2908_v10 = vpop.f32.mrb[56].mxu0  ;;  %3072 = vmatmul.mubr.f32.gmra.mrb[38].mxu1 %v4162_v4  ;;  %3635 = vmatprep.subr.bf16.mxu1 %v3634_v6 }
 0x1b0   :  { %v563_v13 = vpop.f32.mrb[57].mxu0  ;;  %3637 = vmatpush3.bf16.msra.mxu1 %v3634_v6  ;;  %3074 = vmatprep.mubr.f32.mxu1 %v4164_v8  ;;  %v4198_v6 = vld [vmem:[#allocation2 + $0x198] sm:$0xff] }
 0x1b1   :  { %v3638_v16 = vpack.c.bf16 %v2908_v10, %v563_v13  ;;  %4338 = vst [vmem:[#allocation17_spill] sm:$0xff] %v4198_v6  ;;  %v4200_v10 = vld [vmem:[#allocation2 + $0x1a0] sm:$0xff]  ;;  %v4204_v13 = vld [vmem:[#allocation2 + $0x1a8] sm:$0xff] }
 0x1b2   :  { %4339 = vst [vmem:[#allocation18_spill] sm:$0xff] %v4200_v10  ;;  %4340 = vst [vmem:[#allocation19_spill] sm:$0xff] %v4204_v13 }
 0x1b3   :  { %v2911_v23 = vpop.f32.mrb[58].mxu0  ;;  %3075 = vmatmul.mubr.f32.gmra.mrb[40].mxu1 %v4168_v15  ;;  %3639 = vmatprep.subr.bf16.mxu1 %v3638_v16 }
 0x1b4   :  { %v573_v24 = vpop.f32.mrb[59].mxu0  ;;  %3641 = vmatpush3.bf16.msra.mxu1 %v3638_v16  ;;  %3077 = vmatprep.mubr.f32.mxu1 %v4170_v20  ;;  %v4206_v16 = vld [vmem:[#allocation2 + $0x1b0] sm:$0xff] }
 0x1b5   :  { %v3642_v30 = vpack.c.bf16 %v2911_v23, %v573_v24  ;;  %4341 = vst [vmem:[#allocation20_spill] sm:$0xff] %v4206_v16  ;;  %v4210_v23 = vld [vmem:[#allocation2 + $0x1b8] sm:$0xff]  ;;  %v4212_v24 = vld [vmem:[#allocation2 + $0x1c0] sm:$0xff] }
 0x1b6   :  { %4342 = vst [vmem:[#allocation21_spill] sm:$0xff] %v4210_v23  ;;  %4343 = vst [vmem:[#allocation22_spill] sm:$0xff] %v4212_v24 }
 0x1b7   :  { %v2914_v35 = vpop.f32.mrb[60].mxu0  ;;  %3078 = vmatmul.mubr.f32.gmra.mrb[42].mxu1 %v4174_v27  ;;  %3643 = vmatprep.subr.bf16.mxu1 %v3642_v30 }
 0x1b8   :  { %v583_v38 = vpop.f32.mrb[61].mxu0  ;;  %3645 = vmatpush3.bf16.msra.mxu1 %v3642_v30  ;;  %3080 = vmatprep.mubr.f32.mxu1 %v4176_v31  ;;  %v4216_v30 = vld [vmem:[#allocation2 + $0x1c8] sm:$0xff] }
 0x1b9   :  { %v3646_v43 = vpack.c.bf16 %v2914_v35, %v583_v38  ;;  %4344 = vst [vmem:[#allocation23_spill] sm:$0xff] %v4216_v30  ;;  %v4218_v35 = vld [vmem:[#allocation2 + $0x1d0] sm:$0xff]  ;;  %v4222_v38 = vld [vmem:[#allocation2 + $0x1d8] sm:$0xff] }
 0x1ba   :  { %4345 = vst [vmem:[#allocation24_spill] sm:$0xff] %v4218_v35  ;;  %4346 = vst [vmem:[#allocation25_spill] sm:$0xff] %v4222_v38 }
 0x1bb   :  { %v2917_v48 = vpop.f32.mrb[62].mxu0  ;;  %3081 = vmatmul.mubr.f32.gmra.mrb[44].mxu1 %v4180_v40  ;;  %3647 = vmatprep.subr.bf16.mxu1 %v3646_v43 }
 0x1bc   :  { %v593_v51 = vpop.f32.mrb[63].mxu0  ;;  %3649 = vmatpush3.bf16.msra.mxu1 %v3646_v43  ;;  %3083 = vmatprep.mubr.f32.mxu1 %v4182_v46  ;;  %v4224_v43 = vld [vmem:[#allocation2 + $0x1e0] sm:$0xff] }
 0x1bd   :  { %v3650_v56 = vpack.c.bf16 %v2917_v48, %v593_v51  ;;  %4347 = vst [vmem:[#allocation26_spill] sm:$0xff] %v4224_v43  ;;  %v4228_v48 = vld [vmem:[#allocation2 + $0x1e8] sm:$0xff]  ;;  %v4230_v51 = vld [vmem:[#allocation2 + $0x1f0] sm:$0xff] }
 0x1be   :  { %4348 = vst [vmem:[#allocation27_spill] sm:$0xff] %v4228_v48  ;;  %4349 = vst [vmem:[#allocation28_spill] sm:$0xff] %v4230_v51 }
 0x1bf   :  { %3084 = vmatmul.mubr.f32.gmra.mrb[46].mxu1 %v4186_v55  ;;  %3651 = vmatprep.subr.bf16.mxu1 %v3650_v56 }
 0x1c0   :  { %3653 = vmatpush3.bf16.msra.mxu1 %v3650_v56  ;;  %3118 = vmatprep.mubr.f32.mxu1 %v4188_v60  ;;  %v4234_v56 = vld [vmem:[#allocation2 + $0x1f8] sm:$0xff] }
 0x1c1   :  { %4350 = vst [vmem:[#allocation29_spill] sm:$0xff] %v4234_v56 }
 0x1c3   :  { %3119 = vmatmul.mubr.f32.vlgmr.msra.gmra.mrb[48].mxu1 %v4192_v0 }
 0x1c4   :  { %3121 = vmatprep.mubr.f32.mxu1 %v4194_v2 }
 0x1c7   :  { %3122 = vmatmul.mubr.f32.gmra.mrb[50].mxu1 %v4198_v6 }
 0x1c8   :  { %3124 = vmatprep.mubr.f32.mxu1 %v4200_v10 }
 0x1cb   :  { %3125 = vmatmul.mubr.f32.gmra.mrb[52].mxu1 %v4204_v13 }
 0x1cc   :  { %3127 = vmatprep.mubr.f32.mxu1 %v4206_v16 }
 0x1cf   :  { %3128 = vmatmul.mubr.f32.gmra.mrb[54].mxu1 %v4210_v23 }
 0x1d0   :  { %3130 = vmatprep.mubr.f32.mxu1 %v4212_v24 }
 0x1d3   :  { %3131 = vmatmul.mubr.f32.gmra.mrb[56].mxu1 %v4216_v30 }
 0x1d4   :  { %3133 = vmatprep.mubr.f32.mxu1 %v4218_v35 }
 0x1d7   :  { %3134 = vmatmul.mubr.f32.gmra.mrb[58].mxu1 %v4222_v38 }
 0x1d8   :  { %3136 = vmatprep.mubr.f32.mxu1 %v4224_v43 }
 0x1db   :  { %3137 = vmatmul.mubr.f32.gmra.mrb[60].mxu1 %v4228_v48 }
 0x1dc   :  { %3139 = vmatprep.mubr.f32.mxu1 %v4230_v51 }
 0x1df   :  { %3140 = vmatmul.mubr.f32.gmra.mrb[62].mxu1 %v4234_v56 }
 0x1e0   :  { %3302 = vmatprep.mubr.f32.mxu1 %v4045_v22 }
 0x236   :  { %v2952_v35 = vpop.f32.mrb[0].mxu1 }
 0x237   :  { %v668_v30 = vpop.f32.mrb[1].mxu1  ;;  %v1183_v38 = vmax.f32 %v2952_v35, 0.0 }
 0x238   :  { %v1182_v24 = vmax.f32 %v668_v30, 0.0 }
 0x23a   :  { %v2955_v23 = vpop.f32.mrb[2].mxu1  ;;  %3174 = vmatprep.mubr.f32.mxu0 %v1182_v24 }
 0x23b   :  { %v678_v43 = vpop.f32.mrb[3].mxu1  ;;  %3175 = vmatmul.mubr.f32.vlgmr.msra.gmra.mrb[64].mxu0 %v1183_v38  ;;  %v1185_v13 = vmax.f32 %v2955_v23, 0.0 }
 0x23c   :  { %v1184_v16 = vmax.f32 %v678_v43, 0.0 }
 0x23e   :  { %v2958_v10 = vpop.f32.mrb[4].mxu1  ;;  %3177 = vmatprep.mubr.f32.mxu0 %v1184_v16 }
 0x23f   :  { %v688_v48 = vpop.f32.mrb[5].mxu1  ;;  %3178 = vmatmul.mubr.f32.gmra.mrb[66].mxu0 %v1185_v13  ;;  %v1187_v6 = vmax.f32 %v2958_v10, 0.0 }
 0x240   :  { %v1186_v51 = vmax.f32 %v688_v48, 0.0 }
 0x242   :  { %v2961_v2 = vpop.f32.mrb[6].mxu1  ;;  %3180 = vmatprep.mubr.f32.mxu0 %v1186_v51 }
 0x243   :  { %v698_v56 = vpop.f32.mrb[7].mxu1  ;;  %3181 = vmatmul.mubr.f32.gmra.mrb[68].mxu0 %v1187_v6  ;;  %v1189_v0 = vmax.f32 %v2961_v2, 0.0 }
 0x244   :  { %v1188_v22 = vmax.f32 %v698_v56, 0.0 }
 0x246   :  { %v2964_v30 = vpop.f32.mrb[8].mxu1  ;;  %3183 = vmatprep.mubr.f32.mxu0 %v1188_v22 }
 0x247   :  { %v708_v35 = vpop.f32.mrb[9].mxu1  ;;  %3184 = vmatmul.mubr.f32.gmra.mrb[70].mxu0 %v1189_v0  ;;  %v1191_v38 = vmax.f32 %v2964_v30, 0.0 }
 0x248   :  { %v1190_v24 = vmax.f32 %v708_v35, 0.0 }
 0x24a   :  { %v2967_v43 = vpop.f32.mrb[10].mxu1  ;;  %3186 = vmatprep.mubr.f32.mxu0 %v1190_v24 }
 0x24b   :  { %v718_v23 = vpop.f32.mrb[11].mxu1  ;;  %3187 = vmatmul.mubr.f32.gmra.mrb[72].mxu0 %v1191_v38  ;;  %v1193_v13 = vmax.f32 %v2967_v43, 0.0 }
 0x24c   :  { %v1192_v16 = vmax.f32 %v718_v23, 0.0 }
 0x24e   :  { %v2970_v48 = vpop.f32.mrb[12].mxu1  ;;  %3189 = vmatprep.mubr.f32.mxu0 %v1192_v16 }
 0x24f   :  { %v728_v10 = vpop.f32.mrb[13].mxu1  ;;  %3190 = vmatmul.mubr.f32.gmra.mrb[74].mxu0 %v1193_v13  ;;  %v1195_v6 = vmax.f32 %v2970_v48, 0.0 }
 0x250   :  { %v1194_v51 = vmax.f32 %v728_v10, 0.0 }
 0x252   :  { %v2973_v56 = vpop.f32.mrb[14].mxu1  ;;  %3192 = vmatprep.mubr.f32.mxu0 %v1194_v51 }
 0x253   :  { %v738_v2 = vpop.f32.mrb[15].mxu1  ;;  %3193 = vmatmul.mubr.f32.gmra.mrb[76].mxu0 %v1195_v6  ;;  %v1197_v0 = vmax.f32 %v2973_v56, 0.0 }
 0x254   :  { %v1196_v22 = vmax.f32 %v738_v2, 0.0 }
 0x256   :  { %v3008_v35 = vpop.f32.mrb[16].mxu1  ;;  %3195 = vmatprep.mubr.f32.mxu0 %v1196_v22 }
 0x257   :  { %v813_v30 = vpop.f32.mrb[17].mxu1  ;;  %3196 = vmatmul.mubr.f32.gmra.mrb[78].mxu0 %v1197_v0  ;;  %v1199_v38 = vmax.f32 %v3008_v35, 0.0 }
 0x258   :  { %v1198_v24 = vmax.f32 %v813_v30, 0.0 }
 0x25a   :  { %v3011_v23 = vpop.f32.mrb[18].mxu1  ;;  %3198 = vmatprep.mubr.f32.mxu0 %v1198_v24 }
 0x25b   :  { %v823_v43 = vpop.f32.mrb[19].mxu1  ;;  %3199 = vmatmul.mubr.f32.gmra.mrb[80].mxu0 %v1199_v38  ;;  %v1201_v13 = vmax.f32 %v3011_v23, 0.0 }
 0x25c   :  { %v1200_v16 = vmax.f32 %v823_v43, 0.0 }
 0x25e   :  { %v3014_v10 = vpop.f32.mrb[20].mxu1  ;;  %3201 = vmatprep.mubr.f32.mxu0 %v1200_v16 }
 0x25f   :  { %v833_v48 = vpop.f32.mrb[21].mxu1  ;;  %3202 = vmatmul.mubr.f32.gmra.mrb[82].mxu0 %v1201_v13  ;;  %v1203_v6 = vmax.f32 %v3014_v10, 0.0 }
 0x260   :  { %v1202_v51 = vmax.f32 %v833_v48, 0.0 }
 0x262   :  { %v3017_v2 = vpop.f32.mrb[22].mxu1  ;;  %3204 = vmatprep.mubr.f32.mxu0 %v1202_v51 }
 0x263   :  { %v843_v56 = vpop.f32.mrb[23].mxu1  ;;  %3205 = vmatmul.mubr.f32.gmra.mrb[84].mxu0 %v1203_v6  ;;  %v1205_v0 = vmax.f32 %v3017_v2, 0.0 }
 0x264   :  { %v1204_v22 = vmax.f32 %v843_v56, 0.0 }
 0x266   :  { %v3020_v30 = vpop.f32.mrb[24].mxu1  ;;  %3207 = vmatprep.mubr.f32.mxu0 %v1204_v22 }
 0x267   :  { %v853_v35 = vpop.f32.mrb[25].mxu1  ;;  %3208 = vmatmul.mubr.f32.gmra.mrb[86].mxu0 %v1205_v0  ;;  %v1207_v38 = vmax.f32 %v3020_v30, 0.0 }
 0x268   :  { %v1206_v24 = vmax.f32 %v853_v35, 0.0 }
 0x26a   :  { %v3023_v43 = vpop.f32.mrb[26].mxu1  ;;  %3210 = vmatprep.mubr.f32.mxu0 %v1206_v24 }
 0x26b   :  { %v863_v23 = vpop.f32.mrb[27].mxu1  ;;  %3211 = vmatmul.mubr.f32.gmra.mrb[88].mxu0 %v1207_v38  ;;  %v1209_v13 = vmax.f32 %v3023_v43, 0.0 }
 0x26c   :  { %v1208_v16 = vmax.f32 %v863_v23, 0.0 }
 0x26e   :  { %v3026_v48 = vpop.f32.mrb[28].mxu1  ;;  %3213 = vmatprep.mubr.f32.mxu0 %v1208_v16 }
 0x26f   :  { %v873_v10 = vpop.f32.mrb[29].mxu1  ;;  %3214 = vmatmul.mubr.f32.gmra.mrb[90].mxu0 %v1209_v13  ;;  %v1211_v6 = vmax.f32 %v3026_v48, 0.0 }
 0x270   :  { %v1210_v51 = vmax.f32 %v873_v10, 0.0 }
 0x272   :  { %v3029_v56 = vpop.f32.mrb[30].mxu1  ;;  %3216 = vmatprep.mubr.f32.mxu0 %v1210_v51 }
 0x273   :  { %v883_v2 = vpop.f32.mrb[31].mxu1  ;;  %3217 = vmatmul.mubr.f32.gmra.mrb[92].mxu0 %v1211_v6  ;;  %v1213_v0 = vmax.f32 %v3029_v56, 0.0 }
 0x274   :  { %v1212_v22 = vmax.f32 %v883_v2, 0.0 }
 0x276   :  { %v3064_v35 = vpop.f32.mrb[32].mxu1  ;;  %3219 = vmatprep.mubr.f32.mxu0 %v1212_v22 }
 0x277   :  { %v958_v30 = vpop.f32.mrb[33].mxu1  ;;  %3220 = vmatmul.mubr.f32.gmra.mrb[94].mxu0 %v1213_v0  ;;  %v1215_v38 = vmax.f32 %v3064_v35, 0.0 }
 0x278   :  { %v1214_v24 = vmax.f32 %v958_v30, 0.0 }
 0x27a   :  { %v3067_v23 = vpop.f32.mrb[34].mxu1  ;;  %3222 = vmatprep.mubr.f32.mxu0 %v1214_v24 }
 0x27b   :  { %v968_v43 = vpop.f32.mrb[35].mxu1  ;;  %3223 = vmatmul.mubr.f32.gmra.mrb[96].mxu0 %v1215_v38  ;;  %v1217_v13 = vmax.f32 %v3067_v23, 0.0 }
 0x27c   :  { %v1216_v16 = vmax.f32 %v968_v43, 0.0 }
 0x27e   :  { %v3070_v10 = vpop.f32.mrb[36].mxu1  ;;  %3225 = vmatprep.mubr.f32.mxu0 %v1216_v16 }
 0x27f   :  { %v978_v48 = vpop.f32.mrb[37].mxu1  ;;  %3226 = vmatmul.mubr.f32.gmra.mrb[98].mxu0 %v1217_v13  ;;  %v1219_v6 = vmax.f32 %v3070_v10, 0.0 }
 0x280   :  { %v1218_v51 = vmax.f32 %v978_v48, 0.0 }
 0x282   :  { %v3073_v2 = vpop.f32.mrb[38].mxu1  ;;  %3228 = vmatprep.mubr.f32.mxu0 %v1218_v51 }
 0x283   :  { %v988_v56 = vpop.f32.mrb[39].mxu1  ;;  %3229 = vmatmul.mubr.f32.gmra.mrb[100].mxu0 %v1219_v6  ;;  %v1221_v0 = vmax.f32 %v3073_v2, 0.0 }
 0x284   :  { %v1220_v22 = vmax.f32 %v988_v56, 0.0 }
 0x286   :  { %v3076_v30 = vpop.f32.mrb[40].mxu1  ;;  %3231 = vmatprep.mubr.f32.mxu0 %v1220_v22 }
 0x287   :  { %v998_v35 = vpop.f32.mrb[41].mxu1  ;;  %3232 = vmatmul.mubr.f32.gmra.mrb[102].mxu0 %v1221_v0  ;;  %v1223_v38 = vmax.f32 %v3076_v30, 0.0 }
 0x288   :  { %v1222_v24 = vmax.f32 %v998_v35, 0.0 }
 0x28a   :  { %v3079_v43 = vpop.f32.mrb[42].mxu1  ;;  %3234 = vmatprep.mubr.f32.mxu0 %v1222_v24 }
 0x28b   :  { %v1008_v23 = vpop.f32.mrb[43].mxu1  ;;  %3235 = vmatmul.mubr.f32.gmra.mrb[104].mxu0 %v1223_v38  ;;  %v1225_v13 = vmax.f32 %v3079_v43, 0.0 }
 0x28c   :  { %v1224_v16 = vmax.f32 %v1008_v23, 0.0 }
 0x28e   :  { %v3082_v48 = vpop.f32.mrb[44].mxu1  ;;  %3237 = vmatprep.mubr.f32.mxu0 %v1224_v16 }
 0x28f   :  { %v1018_v10 = vpop.f32.mrb[45].mxu1  ;;  %3238 = vmatmul.mubr.f32.gmra.mrb[106].mxu0 %v1225_v13  ;;  %v1227_v6 = vmax.f32 %v3082_v48, 0.0 }
 0x290   :  { %v1226_v51 = vmax.f32 %v1018_v10, 0.0 }
 0x292   :  { %v3085_v56 = vpop.f32.mrb[46].mxu1  ;;  %3240 = vmatprep.mubr.f32.mxu0 %v1226_v51 }
 0x293   :  { %v1028_v2 = vpop.f32.mrb[47].mxu1  ;;  %3241 = vmatmul.mubr.f32.gmra.mrb[108].mxu0 %v1227_v6  ;;  %v1229_v0 = vmax.f32 %v3085_v56, 0.0 }
 0x294   :  { %v1228_v22 = vmax.f32 %v1028_v2, 0.0 }
 0x296   :  { %v3120_v35 = vpop.f32.mrb[48].mxu1  ;;  %3243 = vmatprep.mubr.f32.mxu0 %v1228_v22 }
 0x297   :  { %v1103_v30 = vpop.f32.mrb[49].mxu1  ;;  %3244 = vmatmul.mubr.f32.gmra.mrb[110].mxu0 %v1229_v0  ;;  %v1231_v38 = vmax.f32 %v3120_v35, 0.0 }
 0x298   :  { %v1230_v24 = vmax.f32 %v1103_v30, 0.0 }
 0x29a   :  { %v3123_v23 = vpop.f32.mrb[50].mxu1  ;;  %3246 = vmatprep.mubr.f32.mxu0 %v1230_v24 }
 0x29b   :  { %v1113_v43 = vpop.f32.mrb[51].mxu1  ;;  %3247 = vmatmul.mubr.f32.gmra.mrb[112].mxu0 %v1231_v38  ;;  %v1233_v13 = vmax.f32 %v3123_v23, 0.0 }
 0x29c   :  { %v1232_v16 = vmax.f32 %v1113_v43, 0.0 }
 0x29e   :  { %v3126_v10 = vpop.f32.mrb[52].mxu1  ;;  %3249 = vmatprep.mubr.f32.mxu0 %v1232_v16 }
 0x29f   :  { %v1123_v48 = vpop.f32.mrb[53].mxu1  ;;  %3250 = vmatmul.mubr.f32.gmra.mrb[114].mxu0 %v1233_v13  ;;  %v1235_v6 = vmax.f32 %v3126_v10, 0.0 }
 0x2a0   :  { %v1234_v51 = vmax.f32 %v1123_v48, 0.0 }
 0x2a2   :  { %v3129_v2 = vpop.f32.mrb[54].mxu1  ;;  %3252 = vmatprep.mubr.f32.mxu0 %v1234_v51 }
 0x2a3   :  { %v1133_v56 = vpop.f32.mrb[55].mxu1  ;;  %3253 = vmatmul.mubr.f32.gmra.mrb[116].mxu0 %v1235_v6  ;;  %v1237_v0 = vmax.f32 %v3129_v2, 0.0 }
 0x2a4   :  { %v1236_v22 = vmax.f32 %v1133_v56, 0.0 }
 0x2a6   :  { %v3132_v30 = vpop.f32.mrb[56].mxu1  ;;  %3255 = vmatprep.mubr.f32.mxu0 %v1236_v22 }
 0x2a7   :  { %v1143_v35 = vpop.f32.mrb[57].mxu1  ;;  %3256 = vmatmul.mubr.f32.gmra.mrb[118].mxu0 %v1237_v0  ;;  %v1239_v38 = vmax.f32 %v3132_v30, 0.0 }
 0x2a8   :  { %v1238_v24 = vmax.f32 %v1143_v35, 0.0 }
 0x2aa   :  { %v3135_v43 = vpop.f32.mrb[58].mxu1  ;;  %3258 = vmatprep.mubr.f32.mxu0 %v1238_v24 }
 0x2ab   :  { %v1153_v23 = vpop.f32.mrb[59].mxu1  ;;  %3259 = vmatmul.mubr.f32.gmra.mrb[120].mxu0 %v1239_v38  ;;  %v1241_v13 = vmax.f32 %v3135_v43, 0.0 }
 0x2ac   :  { %v1240_v16 = vmax.f32 %v1153_v23, 0.0 }
 0x2ae   :  { %v3138_v48 = vpop.f32.mrb[60].mxu1  ;;  %3261 = vmatprep.mubr.f32.mxu0 %v1240_v16 }
 0x2af   :  { %v1163_v10 = vpop.f32.mrb[61].mxu1  ;;  %3262 = vmatmul.mubr.f32.gmra.mrb[122].mxu0 %v1241_v13  ;;  %v1243_v6 = vmax.f32 %v3138_v48, 0.0 }
 0x2b0   :  { %v1242_v51 = vmax.f32 %v1163_v10, 0.0 }
 0x2b2   :  { %v3141_v56 = vpop.f32.mrb[62].mxu1  ;;  %3264 = vmatprep.mubr.f32.mxu0 %v1242_v51 }
 0x2b3   :  { %v1173_v2 = vpop.f32.mrb[63].mxu1  ;;  %3265 = vmatmul.mubr.f32.gmra.mrb[124].mxu0 %v1243_v6  ;;  %v1245_v0 = vmax.f32 %v3141_v56, 0.0 }
 0x2b4   :  { %v1244_v22 = vmax.f32 %v1173_v2, 0.0 }
 0x2b6   :  { %3267 = vmatprep.mubr.f32.mxu0 %v1244_v22 }
 0x2b7   :  { %3268 = vmatmul.mubr.f32.gmra.mrb[126].mxu0 %v1245_v0 }
 0x30e   :  { %v3176_v30 = vpop.f32.mrb[64].mxu0 }
 0x30f   :  { %v1328_v35 = vpop.f32.mrb[65].mxu0 }
 0x310   :  { %v3686_v24 = vpack.c.bf16 %v3176_v30, %v1328_v35 }
 0x312   :  { %v3179_v38 = vpop.f32.mrb[66].mxu0  ;;  %3687 = vmatprep.subr.bf16.mxu1 %v3686_v24 }
 0x313   :  { %v1338_v43 = vpop.f32.mrb[67].mxu0  ;;  %3689 = vmatpush3.bf16.msra.mxu1 %v3686_v24 }
 0x314   :  { %v3690_v23 = vpack.c.bf16 %v3179_v38, %v1338_v43 }
 0x316   :  { %v3182_v16 = vpop.f32.mrb[68].mxu0  ;;  %3691 = vmatprep.subr.bf16.mxu1 %v3690_v23 }
 0x317   :  { %v1348_v13 = vpop.f32.mrb[69].mxu0  ;;  %3693 = vmatpush3.bf16.msra.mxu1 %v3690_v23 }
 0x318   :  { %v3694_v48 = vpack.c.bf16 %v3182_v16, %v1348_v13 }
 0x31a   :  { %v3185_v10 = vpop.f32.mrb[70].mxu0  ;;  %3695 = vmatprep.subr.bf16.mxu1 %v3694_v48 }
 0x31b   :  { %v1358_v51 = vpop.f32.mrb[71].mxu0  ;;  %3697 = vmatpush3.bf16.msra.mxu1 %v3694_v48 }
 0x31c   :  { %v3698_v6 = vpack.c.bf16 %v3185_v10, %v1358_v51 }
 0x31e   :  { %v3188_v56 = vpop.f32.mrb[72].mxu0  ;;  %3699 = vmatprep.subr.bf16.mxu1 %v3698_v6 }
 0x31f   :  { %v1368_v2 = vpop.f32.mrb[73].mxu0  ;;  %3701 = vmatpush3.bf16.msra.mxu1 %v3698_v6 }
 0x320   :  { %v3702_v22 = vpack.c.bf16 %v3188_v56, %v1368_v2 }
 0x322   :  { %v3191_v0 = vpop.f32.mrb[74].mxu0  ;;  %3703 = vmatprep.subr.bf16.mxu1 %v3702_v22 }
 0x323   :  { %v1378_v30 = vpop.f32.mrb[75].mxu0  ;;  %3705 = vmatpush3.bf16.msra.mxu1 %v3702_v22 }
 0x324   :  { %v3706_v35 = vpack.c.bf16 %v3191_v0, %v1378_v30 }
 0x326   :  { %v3194_v24 = vpop.f32.mrb[76].mxu0  ;;  %3707 = vmatprep.subr.bf16.mxu1 %v3706_v35 }
 0x327   :  { %v1388_v38 = vpop.f32.mrb[77].mxu0  ;;  %3709 = vmatpush3.bf16.msra.mxu1 %v3706_v35 }
 0x328   :  { %v3710_v43 = vpack.c.bf16 %v3194_v24, %v1388_v38 }
 0x32a   :  { %v3197_v23 = vpop.f32.mrb[78].mxu0  ;;  %3711 = vmatprep.subr.bf16.mxu1 %v3710_v43 }
 0x32b   :  { %v1398_v16 = vpop.f32.mrb[79].mxu0  ;;  %3713 = vmatpush3.bf16.msra.mxu1 %v3710_v43 }
 0x32c   :  { %v3714_v13 = vpack.c.bf16 %v3197_v23, %v1398_v16 }
 0x32e   :  { %v3200_v48 = vpop.f32.mrb[80].mxu0  ;;  %3715 = vmatprep.subr.bf16.mxu1 %v3714_v13 }
 0x32f   :  { %v1408_v10 = vpop.f32.mrb[81].mxu0  ;;  %3717 = vmatpush3.bf16.msra.mxu1 %v3714_v13 }
 0x330   :  { %v3718_v51 = vpack.c.bf16 %v3200_v48, %v1408_v10 }
 0x332   :  { %v3203_v6 = vpop.f32.mrb[82].mxu0  ;;  %3303 = vmatmul.mubr.f32.vlgmr.msra.gmra.mrb[64].mxu1 %v4048_v63  ;;  %3719 = vmatprep.subr.bf16.mxu1 %v3718_v51 }
 0x333   :  { %v1418_v56 = vpop.f32.mrb[83].mxu0  ;;  %3721 = vmatpush3.bf16.msra.mxu1 %v3718_v51  ;;  %3305 = vmatprep.mubr.f32.mxu1 %v4050_v3 }
 0x334   :  { %v3722_v2 = vpack.c.bf16 %v3203_v6, %v1418_v56 }
 0x336   :  { %v3206_v22 = vpop.f32.mrb[84].mxu0  ;;  %3306 = vmatmul.mubr.f32.gmra.mrb[66].mxu1 %v4054_v9  ;;  %3723 = vmatprep.subr.bf16.mxu1 %v3722_v2 }
 0x337   :  { %v1428_v0 = vpop.f32.mrb[85].mxu0  ;;  %3725 = vmatpush3.bf16.msra.mxu1 %v3722_v2  ;;  %3308 = vmatprep.mubr.f32.mxu1 %v4056_v11 }
 0x338   :  { %v3726_v30 = vpack.c.bf16 %v3206_v22, %v1428_v0 }
 0x33a   :  { %v3209_v35 = vpop.f32.mrb[86].mxu0  ;;  %3309 = vmatmul.mubr.f32.gmra.mrb[68].mxu1 %v4060_v17  ;;  %3727 = vmatprep.subr.bf16.mxu1 %v3726_v30 }
 0x33b   :  { %v1438_v63 = vpop.f32.mrb[87].mxu0  ;;  %3729 = vmatpush3.bf16.msra.mxu1 %v3726_v30  ;;  %3311 = vmatprep.mubr.f32.mxu1 %v4062_v19 }
 0x33c   :  { %v3730_v24 = vpack.c.bf16 %v3209_v35, %v1438_v63 }
 0x33e   :  { %v3212_v3 = vpop.f32.mrb[88].mxu0  ;;  %3312 = vmatmul.mubr.f32.gmra.mrb[70].mxu1 %v4066_v26  ;;  %3731 = vmatprep.subr.bf16.mxu1 %v3730_v24 }
 0x33f   :  { %v1448_v9 = vpop.f32.mrb[89].mxu0  ;;  %3733 = vmatpush3.bf16.msra.mxu1 %v3730_v24  ;;  %3314 = vmatprep.mubr.f32.mxu1 %v4068_v28 }
 0x340   :  { %v3734_v38 = vpack.c.bf16 %v3212_v3, %v1448_v9 }
 0x342   :  { %v3215_v11 = vpop.f32.mrb[90].mxu0  ;;  %3315 = vmatmul.mubr.f32.gmra.mrb[72].mxu1 %v4072_v32  ;;  %3735 = vmatprep.subr.bf16.mxu1 %v3734_v38 }
 0x343   :  { %v1458_v17 = vpop.f32.mrb[91].mxu0  ;;  %3737 = vmatpush3.bf16.msra.mxu1 %v3734_v38  ;;  %3317 = vmatprep.mubr.f32.mxu1 %v4074_v34 }
 0x344   :  { %v3738_v43 = vpack.c.bf16 %v3215_v11, %v1458_v17  ;;  %v4354_v11 = vld [vmem:[#allocation18_spill] sm:$0xff]  ;;  %v4356_v17 = vld [vmem:[#allocation20_spill] sm:$0xff] }
 0x346   :  { %v3218_v19 = vpop.f32.mrb[92].mxu0  ;;  %3318 = vmatmul.mubr.f32.gmra.mrb[74].mxu1 %v4078_v37  ;;  %3739 = vmatprep.subr.bf16.mxu1 %v3738_v43 }
 0x347   :  { %v1468_v26 = vpop.f32.mrb[93].mxu0  ;;  %3741 = vmatpush3.bf16.msra.mxu1 %v3738_v43  ;;  %3320 = vmatprep.mubr.f32.mxu1 %v4080_v39  ;;  %v4358_v43 = vld [vmem:[#allocation22_spill] sm:$0xff] }
 0x348   :  { %v3742_v23 = vpack.c.bf16 %v3218_v19, %v1468_v26  ;;  %v4360_v19 = vld [vmem:[#allocation24_spill] sm:$0xff]  ;;  %v4362_v26 = vld [vmem:[#allocation26_spill] sm:$0xff] }
 0x34a   :  { %v3221_v28 = vpop.f32.mrb[94].mxu0  ;;  %3321 = vmatmul.mubr.f32.gmra.mrb[76].mxu1 %v4084_v42  ;;  %3743 = vmatprep.subr.bf16.mxu1 %v3742_v23 }
 0x34b   :  { %v1478_v32 = vpop.f32.mrb[95].mxu0  ;;  %3745 = vmatpush3.bf16.msra.mxu1 %v3742_v23  ;;  %3323 = vmatprep.mubr.f32.mxu1 %v4086_v44  ;;  %v4363_v23 = vld [vmem:[#allocation27_spill] sm:$0xff] }
 0x34c   :  { %v3746_v16 = vpack.c.bf16 %v3221_v28, %v1478_v32  ;;  %v4364_v28 = vld [vmem:[#allocation28_spill] sm:$0xff]  ;;  %v4365_v32 = vld [vmem:[#allocation29_spill] sm:$0xff] }
 0x34e   :  { %v3224_v34 = vpop.f32.mrb[96].mxu0  ;;  %3324 = vmatmul.mubr.f32.gmra.mrb[78].mxu1 %v4090_v47  ;;  %3747 = vmatprep.subr.bf16.mxu1 %v3746_v16 }
 0x34f   :  { %v1488_v37 = vpop.f32.mrb[97].mxu0  ;;  %3749 = vmatpush3.bf16.msra.mxu1 %v3746_v16  ;;  %3358 = vmatprep.mubr.f32.mxu1 %v4092_v49 }
 0x350   :  { %v3750_v13 = vpack.c.bf16 %v3224_v34, %v1488_v37 }
 0x352   :  { %v3227_v39 = vpop.f32.mrb[98].mxu0  ;;  %3359 = vmatmul.mubr.f32.vlgmr.msra.gmra.mrb[80].mxu1 %v4096_v52  ;;  %3751 = vmatprep.subr.bf16.mxu1 %v3750_v13 }
 0x353   :  { %v1498_v42 = vpop.f32.mrb[99].mxu0  ;;  %3753 = vmatpush3.bf16.msra.mxu1 %v3750_v13  ;;  %3361 = vmatprep.mubr.f32.mxu1 %v4098_v54 }
 0x354   :  { %v3754_v48 = vpack.c.bf16 %v3227_v39, %v1498_v42 }
 0x356   :  { %v3230_v44 = vpop.f32.mrb[100].mxu0  ;;  %3362 = vmatmul.mubr.f32.gmra.mrb[82].mxu1 %v4102_v57  ;;  %3755 = vmatprep.subr.bf16.mxu1 %v3754_v48 }
 0x357   :  { %v1508_v47 = vpop.f32.mrb[101].mxu0  ;;  %3757 = vmatpush3.bf16.msra.mxu1 %v3754_v48  ;;  %3364 = vmatprep.mubr.f32.mxu1 %v4104_v59 }
 0x358   :  { %v3758_v10 = vpack.c.bf16 %v3230_v44, %v1508_v47 }
 0x35a   :  { %v3233_v49 = vpop.f32.mrb[102].mxu0  ;;  %3365 = vmatmul.mubr.f32.gmra.mrb[84].mxu1 %v4108_v62  ;;  %3759 = vmatprep.subr.bf16.mxu1 %v3758_v10 }
 0x35b   :  { %v1518_v52 = vpop.f32.mrb[103].mxu0  ;;  %3761 = vmatpush3.bf16.msra.mxu1 %v3758_v10  ;;  %3367 = vmatprep.mubr.f32.mxu1 %v4110_v1 }
 0x35c   :  { %v3762_v51 = vpack.c.bf16 %v3233_v49, %v1518_v52 }
 0x35e   :  { %v3236_v54 = vpop.f32.mrb[104].mxu0  ;;  %3368 = vmatmul.mubr.f32.gmra.mrb[86].mxu1 %v4114_v5  ;;  %3763 = vmatprep.subr.bf16.mxu1 %v3762_v51 }
 0x35f   :  { %v1528_v57 = vpop.f32.mrb[105].mxu0  ;;  %3765 = vmatpush3.bf16.msra.mxu1 %v3762_v51  ;;  %3370 = vmatprep.mubr.f32.mxu1 %v4116_v7 }
 0x360   :  { %v3766_v6 = vpack.c.bf16 %v3236_v54, %v1528_v57 }
 0x362   :  { %v3239_v59 = vpop.f32.mrb[106].mxu0  ;;  %3371 = vmatmul.mubr.f32.gmra.mrb[88].mxu1 %v4120_v12  ;;  %3767 = vmatprep.subr.bf16.mxu1 %v3766_v6 }
 0x363   :  { %v1538_v62 = vpop.f32.mrb[107].mxu0  ;;  %3769 = vmatpush3.bf16.msra.mxu1 %v3766_v6  ;;  %3373 = vmatprep.mubr.f32.mxu1 %v4122_v14 }
 0x364   :  { %v3770_v56 = vpack.c.bf16 %v3239_v59, %v1538_v62 }
 0x366   :  { %v3242_v1 = vpop.f32.mrb[108].mxu0  ;;  %3374 = vmatmul.mubr.f32.gmra.mrb[90].mxu1 %v4126_v18  ;;  %3771 = vmatprep.subr.bf16.mxu1 %v3770_v56 }
 0x367   :  { %v1548_v5 = vpop.f32.mrb[109].mxu0  ;;  %3773 = vmatpush3.bf16.msra.mxu1 %v3770_v56  ;;  %3376 = vmatprep.mubr.f32.mxu1 %v4128_v21 }
 0x368   :  { %v3774_v2 = vpack.c.bf16 %v3242_v1, %v1548_v5 }
 0x36a   :  { %v3245_v7 = vpop.f32.mrb[110].mxu0  ;;  %3377 = vmatmul.mubr.f32.gmra.mrb[92].mxu1 %v4132_v25  ;;  %3775 = vmatprep.subr.bf16.mxu1 %v3774_v2 }
 0x36b   :  { %v1558_v12 = vpop.f32.mrb[111].mxu0  ;;  %3777 = vmatpush3.bf16.msra.mxu1 %v3774_v2  ;;  %3379 = vmatprep.mubr.f32.mxu1 %v4134_v29 }
 0x36c   :  { %v3778_v22 = vpack.c.bf16 %v3245_v7, %v1558_v12 }
 0x36e   :  { %v3248_v14 = vpop.f32.mrb[112].mxu0  ;;  %3380 = vmatmul.mubr.f32.gmra.mrb[94].mxu1 %v4138_v33  ;;  %3779 = vmatprep.subr.bf16.mxu1 %v3778_v22 }
 0x36f   :  { %v1568_v18 = vpop.f32.mrb[113].mxu0  ;;  %3781 = vmatpush3.bf16.msra.mxu1 %v3778_v22  ;;  %3414 = vmatprep.mubr.f32.mxu1 %v4140_v36 }
 0x370   :  { %v3782_v0 = vpack.c.bf16 %v3248_v14, %v1568_v18 }
 0x372   :  { %v3251_v21 = vpop.f32.mrb[114].mxu0  ;;  %3415 = vmatmul.mubr.f32.vlgmr.msra.gmra.mrb[96].mxu1 %v4144_v41  ;;  %3783 = vmatprep.subr.bf16.mxu1 %v3782_v0 }
 0x373   :  { %v1578_v25 = vpop.f32.mrb[115].mxu0  ;;  %3785 = vmatpush3.bf16.msra.mxu1 %v3782_v0  ;;  %3417 = vmatprep.mubr.f32.mxu1 %v4146_v45 }
 0x374   :  { %v3786_v30 = vpack.c.bf16 %v3251_v21, %v1578_v25 }
 0x376   :  { %v3254_v29 = vpop.f32.mrb[116].mxu0  ;;  %3418 = vmatmul.mubr.f32.gmra.mrb[98].mxu1 %v4150_v50  ;;  %3787 = vmatprep.subr.bf16.mxu1 %v3786_v30 }
 0x377   :  { %v1588_v33 = vpop.f32.mrb[117].mxu0  ;;  %3789 = vmatpush3.bf16.msra.mxu1 %v3786_v30  ;;  %3420 = vmatprep.mubr.f32.mxu1 %v4152_v53 }
 0x378   :  { %v3790_v35 = vpack.c.bf16 %v3254_v29, %v1588_v33 }
 0x37a   :  { %v3257_v36 = vpop.f32.mrb[118].mxu0  ;;  %3421 = vmatmul.mubr.f32.gmra.mrb[100].mxu1 %v4156_v58  ;;  %3791 = vmatprep.subr.bf16.mxu1 %v3790_v35 }
 0x37b   :  { %v1598_v41 = vpop.f32.mrb[119].mxu0  ;;  %3793 = vmatpush3.bf16.msra.mxu1 %v3790_v35  ;;  %3423 = vmatprep.mubr.f32.mxu1 %v4158_v61 }
 0x37c   :  { %v3794_v63 = vpack.c.bf16 %v3257_v36, %v1598_v41 }
 0x37e   :  { %v3260_v45 = vpop.f32.mrb[120].mxu0  ;;  %3424 = vmatmul.mubr.f32.gmra.mrb[102].mxu1 %v4162_v4  ;;  %3795 = vmatprep.subr.bf16.mxu1 %v3794_v63 }
 0x37f   :  { %v1608_v50 = vpop.f32.mrb[121].mxu0  ;;  %3797 = vmatpush3.bf16.msra.mxu1 %v3794_v63  ;;  %3426 = vmatprep.mubr.f32.mxu1 %v4164_v8 }
 0x380   :  { %v3798_v24 = vpack.c.bf16 %v3260_v45, %v1608_v50 }
 0x382   :  { %v3263_v53 = vpop.f32.mrb[122].mxu0  ;;  %3427 = vmatmul.mubr.f32.gmra.mrb[104].mxu1 %v4168_v15  ;;  %3799 = vmatprep.subr.bf16.mxu1 %v3798_v24 }
 0x383   :  { %v1618_v58 = vpop.f32.mrb[123].mxu0  ;;  %3801 = vmatpush3.bf16.msra.mxu1 %v3798_v24  ;;  %3429 = vmatprep.mubr.f32.mxu1 %v4170_v20  ;;  %v4351_v20 = vld [vmem:[#allocation15_spill] sm:$0xff] }
 0x384   :  { %v3802_v3 = vpack.c.bf16 %v3263_v53, %v1618_v58 }
 0x386   :  { %v3266_v61 = vpop.f32.mrb[124].mxu0  ;;  %3430 = vmatmul.mubr.f32.gmra.mrb[106].mxu1 %v4174_v27  ;;  %3803 = vmatprep.subr.bf16.mxu1 %v3802_v3  ;;  %v4352_v27 = vld [vmem:[#allocation16_spill] sm:$0xff] }
 0x387   :  { %v1628_v4 = vpop.f32.mrb[125].mxu0  ;;  %3805 = vmatpush3.bf16.msra.mxu1 %v3802_v3  ;;  %3432 = vmatprep.mubr.f32.mxu1 %v4176_v31  ;;  %v4353_v31 = vld [vmem:[#allocation17_spill] sm:$0xff] }
 0x388   :  { %v3806_v9 = vpack.c.bf16 %v3266_v61, %v1628_v4 }
 0x38a   :  { %v3269_v8 = vpop.f32.mrb[126].mxu0  ;;  %3433 = vmatmul.mubr.f32.gmra.mrb[108].mxu1 %v4180_v40  ;;  %3807 = vmatprep.subr.bf16.mxu1 %v3806_v9  ;;  %v4355_v40 = vld [vmem:[#allocation19_spill] sm:$0xff] }
 0x38b   :  { %v1638_v15 = vpop.f32.mrb[127].mxu0  ;;  %3809 = vmatpush3.bf16.msra.mxu1 %v3806_v9  ;;  %3435 = vmatprep.mubr.f32.mxu1 %v4182_v46  ;;  %v4357_v46 = vld [vmem:[#allocation21_spill] sm:$0xff] }
 0x38c   :  { %v3810_v38 = vpack.c.bf16 %v3269_v8, %v1638_v15 }
 0x38e   :  { %3436 = vmatmul.mubr.f32.gmra.mrb[110].mxu1 %v4186_v55  ;;  %3811 = vmatprep.subr.bf16.mxu1 %v3810_v38  ;;  %v4359_v55 = vld [vmem:[#allocation23_spill] sm:$0xff] }
 0x38f   :  { %3813 = vmatpush3.bf16.msra.mxu1 %v3810_v38  ;;  %3470 = vmatprep.mubr.f32.mxu1 %v4188_v60  ;;  %v4361_v60 = vld [vmem:[#allocation25_spill] sm:$0xff] }
 0x392   :  { %3471 = vmatmul.mubr.f32.vlgmr.msra.gmra.mrb[112].mxu1 %v4351_v20 }
 0x393   :  { %3473 = vmatprep.mubr.f32.mxu1 %v4352_v27 }
 0x396   :  { %3474 = vmatmul.mubr.f32.gmra.mrb[114].mxu1 %v4353_v31 }
 0x397   :  { %3476 = vmatprep.mubr.f32.mxu1 %v4354_v11 }
 0x39a   :  { %3477 = vmatmul.mubr.f32.gmra.mrb[116].mxu1 %v4355_v40 }
 0x39b   :  { %3479 = vmatprep.mubr.f32.mxu1 %v4356_v17 }
 0x39e   :  { %3480 = vmatmul.mubr.f32.gmra.mrb[118].mxu1 %v4357_v46 }
 0x39f   :  { %3482 = vmatprep.mubr.f32.mxu1 %v4358_v43 }
 0x3a2   :  { %3483 = vmatmul.mubr.f32.gmra.mrb[120].mxu1 %v4359_v55 }
 0x3a3   :  { %3485 = vmatprep.mubr.f32.mxu1 %v4360_v19 }
 0x3a6   :  { %3486 = vmatmul.mubr.f32.gmra.mrb[122].mxu1 %v4361_v60 }
 0x3a7   :  { %3488 = vmatprep.mubr.f32.mxu1 %v4362_v26 }
 0x3aa   :  { %3489 = vmatmul.mubr.f32.gmra.mrb[124].mxu1 %v4363_v23 }
 0x3ab   :  { %3491 = vmatprep.mubr.f32.mxu1 %v4364_v28 }
 0x3ae   :  { %3492 = vmatmul.mubr.f32.gmra.mrb[126].mxu1 %v4365_v32 }
 0x405   :  { %v3304_v16 = vpop.f32.mrb[64].mxu1 }
 0x406   :  { %v2228_v34 = vmax.f32 %v3304_v16, 0.0  ;;  %v1713_v37 = vpop.f32.mrb[65].mxu1 }
 0x407   :  { %v2227_v13 = vmax.f32 %v1713_v37, 0.0 }
 0x408   :  { %2292 = vst [vmem:[#allocation10 + $0x8] sm:$0xff] %v2228_v34 }
 0x409   :  { %2291 = vst [vmem:[#allocation10] sm:$0xff] %v2227_v13  ;;  %v3307_v39 = vpop.f32.mrb[66].mxu1 }
 0x40a   :  { %v2230_v42 = vmax.f32 %v3307_v39, 0.0  ;;  %v1723_v48 = vpop.f32.mrb[67].mxu1 }
 0x40b   :  { %v2229_v44 = vmax.f32 %v1723_v48, 0.0 }
 0x40c   :  { %2294 = vst [vmem:[#allocation10 + $0x18] sm:$0xff] %v2230_v42 }
 0x40d   :  { %2293 = vst [vmem:[#allocation10 + $0x10] sm:$0xff] %v2229_v44  ;;  %v3310_v47 = vpop.f32.mrb[68].mxu1 }
 0x40e   :  { %v2232_v10 = vmax.f32 %v3310_v47, 0.0  ;;  %v1733_v49 = vpop.f32.mrb[69].mxu1 }
 0x40f   :  { %v2231_v52 = vmax.f32 %v1733_v49, 0.0 }
 0x410   :  { %2296 = vst [vmem:[#allocation10 + $0x28] sm:$0xff] %v2232_v10 }
 0x411   :  { %2295 = vst [vmem:[#allocation10 + $0x20] sm:$0xff] %v2231_v52  ;;  %v3313_v51 = vpop.f32.mrb[70].mxu1 }
 0x412   :  { %v2234_v54 = vmax.f32 %v3313_v51, 0.0  ;;  %v1743_v57 = vpop.f32.mrb[71].mxu1 }
 0x413   :  { %v2233_v6 = vmax.f32 %v1743_v57, 0.0 }
 0x414   :  { %2298 = vst [vmem:[#allocation10 + $0x38] sm:$0xff] %v2234_v54 }
 0x415   :  { %2297 = vst [vmem:[#allocation10 + $0x30] sm:$0xff] %v2233_v6  ;;  %v3316_v59 = vpop.f32.mrb[72].mxu1 }
 0x416   :  { %v2236_v62 = vmax.f32 %v3316_v59, 0.0  ;;  %v1753_v56 = vpop.f32.mrb[73].mxu1 }
 0x417   :  { %v2235_v1 = vmax.f32 %v1753_v56, 0.0 }
 0x418   :  { %2300 = vst [vmem:[#allocation10 + $0x48] sm:$0xff] %v2236_v62 }
 0x419   :  { %2299 = vst [vmem:[#allocation10 + $0x40] sm:$0xff] %v2235_v1  ;;  %v3319_v5 = vpop.f32.mrb[74].mxu1 }
 0x41a   :  { %v2238_v2 = vmax.f32 %v3319_v5, 0.0  ;;  %v1763_v7 = vpop.f32.mrb[75].mxu1 }
 0x41b   :  { %v2237_v12 = vmax.f32 %v1763_v7, 0.0 }
 0x41c   :  { %2302 = vst [vmem:[#allocation10 + $0x58] sm:$0xff] %v2238_v2 }
 0x41d   :  { %2301 = vst [vmem:[#allocation10 + $0x50] sm:$0xff] %v2237_v12  ;;  %v3322_v22 = vpop.f32.mrb[76].mxu1 }
 0x41e   :  { %v2240_v14 = vmax.f32 %v3322_v22, 0.0  ;;  %v1773_v18 = vpop.f32.mrb[77].mxu1 }
 0x41f   :  { %v2239_v0 = vmax.f32 %v1773_v18, 0.0 }
 0x420   :  { %2304 = vst [vmem:[#allocation10 + $0x68] sm:$0xff] %v2240_v14 }
 0x421   :  { %2303 = vst [vmem:[#allocation10 + $0x60] sm:$0xff] %v2239_v0  ;;  %v3325_v21 = vpop.f32.mrb[78].mxu1 }
 0x422   :  { %v2242_v25 = vmax.f32 %v3325_v21, 0.0  ;;  %v1783_v30 = vpop.f32.mrb[79].mxu1 }
 0x423   :  { %v2241_v29 = vmax.f32 %v1783_v30, 0.0 }
 0x424   :  { %2306 = vst [vmem:[#allocation10 + $0x78] sm:$0xff] %v2242_v25 }
 0x425   :  { %2305 = vst [vmem:[#allocation10 + $0x70] sm:$0xff] %v2241_v29  ;;  %v3360_v33 = vpop.f32.mrb[80].mxu1 }
 0x426   :  { %v2244_v35 = vmax.f32 %v3360_v33, 0.0  ;;  %v1858_v36 = vpop.f32.mrb[81].mxu1 }
 0x427   :  { %v2243_v41 = vmax.f32 %v1858_v36, 0.0 }
 0x428   :  { %2308 = vst [vmem:[#allocation10 + $0x88] sm:$0xff] %v2244_v35 }
 0x429   :  { %2307 = vst [vmem:[#allocation10 + $0x80] sm:$0xff] %v2243_v41  ;;  %v3363_v63 = vpop.f32.mrb[82].mxu1 }
 0x42a   :  { %v2246_v45 = vmax.f32 %v3363_v63, 0.0  ;;  %v1868_v50 = vpop.f32.mrb[83].mxu1 }
 0x42b   :  { %v2245_v24 = vmax.f32 %v1868_v50, 0.0 }
 0x42c   :  { %2310 = vst [vmem:[#allocation10 + $0x98] sm:$0xff] %v2246_v45 }
 0x42d   :  { %2309 = vst [vmem:[#allocation10 + $0x90] sm:$0xff] %v2245_v24  ;;  %v3366_v53 = vpop.f32.mrb[84].mxu1 }
 0x42e   :  { %v2248_v58 = vmax.f32 %v3366_v53, 0.0  ;;  %v1878_v3 = vpop.f32.mrb[85].mxu1 }
 0x42f   :  { %v2247_v61 = vmax.f32 %v1878_v3, 0.0 }
 0x430   :  { %2312 = vst [vmem:[#allocation10 + $0xa8] sm:$0xff] %v2248_v58 }
 0x431   :  { %2311 = vst [vmem:[#allocation10 + $0xa0] sm:$0xff] %v2247_v61  ;;  %v3369_v4 = vpop.f32.mrb[86].mxu1 }
 0x432   :  { %v2250_v9 = vmax.f32 %v3369_v4, 0.0  ;;  %v1888_v8 = vpop.f32.mrb[87].mxu1 }
 0x433   :  { %v2249_v15 = vmax.f32 %v1888_v8, 0.0 }
 0x434   :  { %2314 = vst [vmem:[#allocation10 + $0xb8] sm:$0xff] %v2250_v9 }
 0x435   :  { %2313 = vst [vmem:[#allocation10 + $0xb0] sm:$0xff] %v2249_v15  ;;  %v3372_v38 = vpop.f32.mrb[88].mxu1 }
 0x436   :  { %v2252_v20 = vmax.f32 %v3372_v38, 0.0  ;;  %v1898_v27 = vpop.f32.mrb[89].mxu1 }
 0x437   :  { %v2251_v31 = vmax.f32 %v1898_v27, 0.0 }
 0x438   :  { %2316 = vst [vmem:[#allocation10 + $0xc8] sm:$0xff] %v2252_v20 }
 0x439   :  { %2315 = vst [vmem:[#allocation10 + $0xc0] sm:$0xff] %v2251_v31  ;;  %v3375_v11 = vpop.f32.mrb[90].mxu1 }
 0x43a   :  { %v2254_v40 = vmax.f32 %v3375_v11, 0.0  ;;  %v1908_v17 = vpop.f32.mrb[91].mxu1 }
 0x43b   :  { %v2253_v46 = vmax.f32 %v1908_v17, 0.0 }
 0x43c   :  { %2318 = vst [vmem:[#allocation10 + $0xd8] sm:$0xff] %v2254_v40 }
 0x43d   :  { %2317 = vst [vmem:[#allocation10 + $0xd0] sm:$0xff] %v2253_v46  ;;  %v3378_v43 = vpop.f32.mrb[92].mxu1 }
 0x43e   :  { %v2256_v55 = vmax.f32 %v3378_v43, 0.0  ;;  %v1918_v19 = vpop.f32.mrb[93].mxu1 }
 0x43f   :  { %v2255_v60 = vmax.f32 %v1918_v19, 0.0 }
 0x440   :  { %2320 = vst [vmem:[#allocation10 + $0xe8] sm:$0xff] %v2256_v55 }
 0x441   :  { %2319 = vst [vmem:[#allocation10 + $0xe0] sm:$0xff] %v2255_v60  ;;  %v3381_v26 = vpop.f32.mrb[94].mxu1 }
 0x442   :  { %v2258_v23 = vmax.f32 %v3381_v26, 0.0  ;;  %v1928_v28 = vpop.f32.mrb[95].mxu1 }
 0x443   :  { %v2257_v32 = vmax.f32 %v1928_v28, 0.0 }
 0x444   :  { %2322 = vst [vmem:[#allocation10 + $0xf8] sm:$0xff] %v2258_v23 }
 0x445   :  { %2321 = vst [vmem:[#allocation10 + $0xf0] sm:$0xff] %v2257_v32  ;;  %v3416_v16 = vpop.f32.mrb[96].mxu1 }
 0x446   :  { %v2260_v34 = vmax.f32 %v3416_v16, 0.0  ;;  %v2003_v37 = vpop.f32.mrb[97].mxu1 }
 0x447   :  { %v2259_v13 = vmax.f32 %v2003_v37, 0.0 }
 0x448   :  { %2324 = vst [vmem:[#allocation10 + $0x108] sm:$0xff] %v2260_v34 }
 0x449   :  { %2323 = vst [vmem:[#allocation10 + $0x100] sm:$0xff] %v2259_v13  ;;  %v3419_v39 = vpop.f32.mrb[98].mxu1 }
 0x44a   :  { %v2262_v42 = vmax.f32 %v3419_v39, 0.0  ;;  %v2013_v48 = vpop.f32.mrb[99].mxu1 }
 0x44b   :  { %v2261_v44 = vmax.f32 %v2013_v48, 0.0 }
 0x44c   :  { %2326 = vst [vmem:[#allocation10 + $0x118] sm:$0xff] %v2262_v42 }
 0x44d   :  { %2325 = vst [vmem:[#allocation10 + $0x110] sm:$0xff] %v2261_v44  ;;  %v3422_v47 = vpop.f32.mrb[100].mxu1 }
 0x44e   :  { %v2264_v10 = vmax.f32 %v3422_v47, 0.0  ;;  %v2023_v49 = vpop.f32.mrb[101].mxu1 }
 0x44f   :  { %v2263_v52 = vmax.f32 %v2023_v49, 0.0 }
 0x450   :  { %2328 = vst [vmem:[#allocation10 + $0x128] sm:$0xff] %v2264_v10 }
 0x451   :  { %2327 = vst [vmem:[#allocation10 + $0x120] sm:$0xff] %v2263_v52  ;;  %v3425_v51 = vpop.f32.mrb[102].mxu1 }
 0x452   :  { %v2266_v54 = vmax.f32 %v3425_v51, 0.0  ;;  %v2033_v57 = vpop.f32.mrb[103].mxu1 }
 0x453   :  { %v2265_v6 = vmax.f32 %v2033_v57, 0.0 }
 0x454   :  { %2330 = vst [vmem:[#allocation10 + $0x138] sm:$0xff] %v2266_v54 }
 0x455   :  { %2329 = vst [vmem:[#allocation10 + $0x130] sm:$0xff] %v2265_v6  ;;  %v3428_v59 = vpop.f32.mrb[104].mxu1 }
 0x456   :  { %v2268_v62 = vmax.f32 %v3428_v59, 0.0  ;;  %v2043_v56 = vpop.f32.mrb[105].mxu1 }
 0x457   :  { %v2267_v1 = vmax.f32 %v2043_v56, 0.0 }
 0x458   :  { %2332 = vst [vmem:[#allocation10 + $0x148] sm:$0xff] %v2268_v62 }
 0x459   :  { %2331 = vst [vmem:[#allocation10 + $0x140] sm:$0xff] %v2267_v1  ;;  %v3431_v5 = vpop.f32.mrb[106].mxu1 }
 0x45a   :  { %v2270_v2 = vmax.f32 %v3431_v5, 0.0  ;;  %v2053_v7 = vpop.f32.mrb[107].mxu1 }
 0x45b   :  { %v2269_v12 = vmax.f32 %v2053_v7, 0.0 }
 0x45c   :  { %2334 = vst [vmem:[#allocation10 + $0x158] sm:$0xff] %v2270_v2 }
 0x45d   :  { %2333 = vst [vmem:[#allocation10 + $0x150] sm:$0xff] %v2269_v12  ;;  %v3434_v22 = vpop.f32.mrb[108].mxu1 }
 0x45e   :  { %v2272_v14 = vmax.f32 %v3434_v22, 0.0  ;;  %v2063_v18 = vpop.f32.mrb[109].mxu1 }
 0x45f   :  { %v2271_v0 = vmax.f32 %v2063_v18, 0.0 }
 0x460   :  { %2336 = vst [vmem:[#allocation10 + $0x168] sm:$0xff] %v2272_v14 }
 0x461   :  { %2335 = vst [vmem:[#allocation10 + $0x160] sm:$0xff] %v2271_v0  ;;  %v3437_v21 = vpop.f32.mrb[110].mxu1 }
 0x462   :  { %v2274_v25 = vmax.f32 %v3437_v21, 0.0  ;;  %v2073_v30 = vpop.f32.mrb[111].mxu1 }
 0x463   :  { %v2273_v29 = vmax.f32 %v2073_v30, 0.0 }
 0x464   :  { %2338 = vst [vmem:[#allocation10 + $0x178] sm:$0xff] %v2274_v25 }
 0x465   :  { %2337 = vst [vmem:[#allocation10 + $0x170] sm:$0xff] %v2273_v29  ;;  %v3472_v33 = vpop.f32.mrb[112].mxu1 }
 0x466   :  { %v2276_v35 = vmax.f32 %v3472_v33, 0.0  ;;  %v2148_v36 = vpop.f32.mrb[113].mxu1 }
 0x467   :  { %v2275_v41 = vmax.f32 %v2148_v36, 0.0 }
 0x468   :  { %2340 = vst [vmem:[#allocation10 + $0x188] sm:$0xff] %v2276_v35 }
 0x469   :  { %2339 = vst [vmem:[#allocation10 + $0x180] sm:$0xff] %v2275_v41  ;;  %v3475_v63 = vpop.f32.mrb[114].mxu1 }
 0x46a   :  { %v2278_v45 = vmax.f32 %v3475_v63, 0.0  ;;  %v2158_v50 = vpop.f32.mrb[115].mxu1 }
 0x46b   :  { %v2277_v24 = vmax.f32 %v2158_v50, 0.0 }
 0x46c   :  { %2342 = vst [vmem:[#allocation10 + $0x198] sm:$0xff] %v2278_v45 }
 0x46d   :  { %2341 = vst [vmem:[#allocation10 + $0x190] sm:$0xff] %v2277_v24  ;;  %v3478_v53 = vpop.f32.mrb[116].mxu1 }
 0x46e   :  { %v2280_v58 = vmax.f32 %v3478_v53, 0.0  ;;  %v2168_v3 = vpop.f32.mrb[117].mxu1 }
 0x46f   :  { %v2279_v61 = vmax.f32 %v2168_v3, 0.0 }
 0x470   :  { %2344 = vst [vmem:[#allocation10 + $0x1a8] sm:$0xff] %v2280_v58 }
 0x471   :  { %2343 = vst [vmem:[#allocation10 + $0x1a0] sm:$0xff] %v2279_v61  ;;  %v3481_v4 = vpop.f32.mrb[118].mxu1 }
 0x472   :  { %v2282_v9 = vmax.f32 %v3481_v4, 0.0  ;;  %v2178_v8 = vpop.f32.mrb[119].mxu1 }
 0x473   :  { %v2281_v15 = vmax.f32 %v2178_v8, 0.0 }
 0x474   :  { %2346 = vst [vmem:[#allocation10 + $0x1b8] sm:$0xff] %v2282_v9 }
 0x475   :  { %2345 = vst [vmem:[#allocation10 + $0x1b0] sm:$0xff] %v2281_v15  ;;  %v3484_v38 = vpop.f32.mrb[120].mxu1 }
 0x476   :  { %v2284_v20 = vmax.f32 %v3484_v38, 0.0  ;;  %v2188_v27 = vpop.f32.mrb[121].mxu1 }
 0x477   :  { %v2283_v31 = vmax.f32 %v2188_v27, 0.0 }
 0x478   :  { %2348 = vst [vmem:[#allocation10 + $0x1c8] sm:$0xff] %v2284_v20 }
 0x479   :  { %2347 = vst [vmem:[#allocation10 + $0x1c0] sm:$0xff] %v2283_v31  ;;  %v3487_v11 = vpop.f32.mrb[122].mxu1 }
 0x47a   :  { %v2286_v40 = vmax.f32 %v3487_v11, 0.0  ;;  %v2198_v17 = vpop.f32.mrb[123].mxu1 }
 0x47b   :  { %v2285_v46 = vmax.f32 %v2198_v17, 0.0 }
 0x47c   :  { %2350 = vst [vmem:[#allocation10 + $0x1d8] sm:$0xff] %v2286_v40 }
 0x47d   :  { %2349 = vst [vmem:[#allocation10 + $0x1d0] sm:$0xff] %v2285_v46  ;;  %v3490_v43 = vpop.f32.mrb[124].mxu1 }
 0x47e   :  { %v2288_v55 = vmax.f32 %v3490_v43, 0.0  ;;  %v2208_v19 = vpop.f32.mrb[125].mxu1 }
 0x47f   :  { %v2287_v60 = vmax.f32 %v2208_v19, 0.0 }
 0x480   :  { %2352 = vst [vmem:[#allocation10 + $0x1e8] sm:$0xff] %v2288_v55 }
 0x481   :  { %2351 = vst [vmem:[#allocation10 + $0x1e0] sm:$0xff] %v2287_v60  ;;  %v3493_v26 = vpop.f32.mrb[126].mxu1 }
 0x482   :  { %v2290_v23 = vmax.f32 %v3493_v26, 0.0  ;;  %v2218_v28 = vpop.f32.mrb[127].mxu1 }
 0x483   :  { %v2289_v32 = vmax.f32 %v2218_v28, 0.0 }
 0x484   :  { %2354 = vst [vmem:[#allocation10 + $0x1f8] sm:$0xff] %v2290_v23 }
 0x485   :  { %2353 = vst [vmem:[#allocation10 + $0x1f0] sm:$0xff] %v2289_v32 }
 0x486   :  { %3920 = shalt.err (!%p3917_p8)
}
 0x487   :  { %s3921_s15 = scalar_lea.hbm %s4320_s4, 8192 }
 0x488   :  { %p3922_p9 = scmp.ne.s32.totalorder %s4320_s4, %s3921_s15  ;;  %p3925_p10 = scmp.lt.u32.totalorder %s3921_s15, %s4320_s4 }
 0x48a   :  { %p3927_p11 = pnand %p3925_p10, %p3922_p9 }
 0x48c   :  { %3930 = shalt.err (!%p3927_p11)
}
 0x48d   :  { %2366 = dma.vmem_to_hbm [thread:$0]  %s2361_s12, 8192, %s4320_s4, [#allocation4], %s3941_s27, %s3941_s27, %s3942_s28  }
 0x48e   :  { %3937 = dma.done.wait [#allocation4], 8192  }
 0x48f   :  { %3938 = vsyncadd [#allocation4], 4294959104 }
 0x490   :  { %2370 = vsyncpa [#allocation3], 1 }
 0x491   :  { %2371 = vsyncpa [#allocation6], 1 }
 0x492   :  { %2372 = vsyncpa [#allocation9], 1 }
 0x493   :  { %2373 = vsyncpa [#allocation4], 1 }

</bundles_post_ra>
